<compile_context>
chip_gen: v6e
topology: v6e:2x2x1
jax: 0.10.0
libtpu: 0.0.40
codegen_flags: <defaults>
</compile_context>

<pallas_src>
import functools

import jax
import jax.numpy as jnp
from jax.experimental import pallas as pl
from jax.experimental.pallas import tpu as pltpu


# ----------------------------------------------------------------------------
# Fused kernel: n_layers GRU + flatten + fc1 -> relu -> fc2 -> relu -> fc3.
# ----------------------------------------------------------------------------
def make_fused_gru_head_kernel(n_layers, seq_len, batch, batch_pad, hidden):
    T, B, BP, H = seq_len, batch, batch_pad, hidden

    def kernel(*refs):
        x_ref, h0_ref = refs[0], refs[1]
        layer_refs = refs[2:2 + 4 * n_layers]
        (w1_ref, b1_ref, w2_ref, b2_ref, w3_ref, b3_ref) = refs[
            2 + 4 * n_layers: 2 + 4 * n_layers + 6]
        out_ref = refs[2 + 4 * n_layers + 6]
        seq_scr, flat_scr = refs[-2], refs[-1]   # VMEM scratch slabs

        # TODO(synk): for n_layers >> 1 a wavefront schedule (start layer l step t
        # as soon as layer l-1 emits h_t) would shorten the serial MXU chain from
        # n_layers*T to ~T + n_layers - 1; not worth it at L=2, T=8.
        for layer in range(n_layers):
            wih_ref, whh_ref, bgi_ref, bhn_ref = layer_refs[4 * layer: 4 * layer + 4]

            # ---- hoisted, gate-fused input projection for ALL timesteps -----
            # one (T*BP, in) @ (in, 3H) MXU call + one bias add per layer.
            seq_in = (x_ref[...] if layer == 0 else seq_scr[...]).astype(jnp.float32)
            gi = jnp.dot(seq_in, wih_ref[...],
                         preferred_element_type=jnp.float32) + bgi_ref[...]    # (T*BP, 3H)

            w_hh = whh_ref[...]                                   # (H, 3H), gate-fused
            b_hn = jnp.broadcast_to(bhn_ref[...], (BP, H))        # hoisted out of loop

            h = h0_ref[layer].astype(jnp.float32)                 # (BP, H)
            for t in range(T):                                    # static unroll (T small)
                gi_t = gi[t * BP:(t + 1) * BP]                    # sublane-aligned (BP, 3H)
                # single recurrent MXU op per step on the serial h chain
                gh = jnp.dot(h, w_hh, preferred_element_type=jnp.float32)      # (BP, 3H)
                r = jax.nn.sigmoid(gi_t[:, 0:H] + gh[:, 0:H])
                z = jax.nn.sigmoid(gi_t[:, H:2 * H] + gh[:, H:2 * H])
                n = jnp.tanh(gi_t[:, 2 * H:3 * H] + r * (gh[:, 2 * H:3 * H] + b_hn))
                h = (1.0 - z) * n + z * h
                if layer + 1 < n_layers:
                    seq_scr[t * BP:(t + 1) * BP, :] = h           # aligned vst, feeds next layer
                else:
                    # batch-first flatten: flat[b, t*H + j] == h_t[b, j]
                    flat_scr[:, t * H:(t + 1) * H] = h

        # ---- MLP head (configs.activation == 'relu') ------------------------
        flat = flat_scr[...]                                      # (BP, T*H), lane-dense
        a1 = jnp.maximum(
            jnp.dot(flat, w1_ref[...], preferred_element_type=jnp.float32) + b1_ref[...], 0.0)
        a2 = jnp.maximum(
            jnp.dot(a1, w2_ref[...], preferred_element_type=jnp.float32) + b2_ref[...], 0.0)
        out = jnp.dot(a2, w3_ref[...], preferred_element_type=jnp.float32) + b3_ref[...]
        out_ref[...] = out[:B, :].astype(out_ref.dtype)           # drop padded batch rows

    return kernel


def fused_forward(x_tm_flat, h0, gru_params, head_params, *,
                  n_layers, seq_len, batch, batch_pad, d_model, num_classes):
    flat_layer_args = [a for lp in gru_params for a in lp]
    args = (x_tm_flat, h0, *flat_layer_args, *head_params)
    vmem = pl.BlockSpec(memory_space=pltpu.MemorySpace.VMEM)
    return pl.pallas_call(
        make_fused_gru_head_kernel(n_layers, seq_len, batch, batch_pad, d_model),
        out_shape=jax.ShapeDtypeStruct((batch, num_classes), jnp.float32),
        in_specs=[vmem] * len(args),
        out_specs=vmem,
        scratch_shapes=[
            pltpu.VMEM((seq_len * batch_pad, d_model), jnp.float32),   # inter-layer seq slab
            pltpu.VMEM((batch_pad, seq_len * d_model), jnp.float32),   # head input slab
        ],
        compiler_params=pltpu.CompilerParams(vmem_limit_bytes=32 * 1024 * 1024),
    )(*args)
    # TODO(synk): for realistic configs (d_model*seq_len large) tile the fc1
    # reduction dim with a grid (and cast weights to bf16) so the big fc1 weight
    # streams HBM->VMEM instead of living whole-array in VMEM (v7x: 64 MiB).


# ----------------------------------------------------------------------------
# Model wrapper (parameters created deterministically in-script).
# ----------------------------------------------------------------------------
class GRUModelPallas:
    def __init__(self, *, enc_in, d_model, e_layers, seq_len, num_classes, key):
        self.n_feats = enc_in
        self.d_model = d_model
        self.n_layers = e_layers
        self.seq_len = seq_len
        self.num_classes = num_classes

        keys = jax.random.split(key, 4 * e_layers + 6)
        kidx = 0
        k = 1.0 / jnp.sqrt(d_model)

        # NOTE: if real PyTorch weights are ever loaded, weight_ih_l{k}/weight_hh_l{k}
        # (shape (3H, in)) must be chunked in r/z/n order and transposed to (in, H)
        # before the concatenation below, or results will silently diverge.
        self.gru_params = []
        for layer in range(e_layers):
            in_dim = enc_in if layer == 0 else d_model
            w_ih = jax.random.uniform(keys[kidx], (3, in_dim, d_model),
                                      minval=-k, maxval=k, dtype=jnp.float32); kidx += 1
            w_hh = jax.random.uniform(keys[kidx], (3, d_model, d_model),
                                      minval=-k, maxval=k, dtype=jnp.float32); kidx += 1
            b_ih = jax.random.uniform(keys[kidx], (3, 1, d_model),
                                      minval=-k, maxval=k, dtype=jnp.float32); kidx += 1
            b_hh = jax.random.uniform(keys[kidx], (3, 1, d_model),
                                      minval=-k, maxval=k, dtype=jnp.float32); kidx += 1
            # gate-fused layouts (r | z | n along the lane axis)
            w_ih_cat = jnp.concatenate([w_ih[0], w_ih[1], w_ih[2]], axis=1)    # (in, 3H)
            w_hh_cat = jnp.concatenate([w_hh[0], w_hh[1], w_hh[2]], axis=1)    # (H, 3H)
            # biases pre-folded: r,z get (b_i + b_h) once in the hoisted projection;
            # n keeps b_in hoisted and b_hn applied per step inside r*(...).
            b_gi = jnp.concatenate([b_ih[0] + b_hh[0],
                                    b_ih[1] + b_hh[1],
                                    b_ih[2]], axis=1)                           # (1, 3H)
            b_hn = b_hh[2]                                                      # (1, H)
            self.gru_params.append((w_ih_cat, w_hh_cat, b_gi, b_hn))

        fc1_in = d_model * seq_len
        s1 = 1.0 / jnp.sqrt(fc1_in)
        w1 = jax.random.uniform(keys[kidx], (fc1_in, 256), minval=-s1, maxval=s1,
                                dtype=jnp.float32); kidx += 1
        b1 = jax.random.uniform(keys[kidx], (1, 256), minval=-s1, maxval=s1,
                                dtype=jnp.float32); kidx += 1
        s2 = 1.0 / jnp.sqrt(256.0)
        w2 = jax.random.uniform(keys[kidx], (256, 64), minval=-s2, maxval=s2,
                                dtype=jnp.float32); kidx += 1
        b2 = jax.random.uniform(keys[kidx], (1, 64), minval=-s2, maxval=s2,
                                dtype=jnp.float32); kidx += 1
        s3 = 1.0 / jnp.sqrt(64.0)
        w3 = jax.random.uniform(keys[kidx], (64, num_classes), minval=-s3, maxval=s3,
                                dtype=jnp.float32); kidx += 1
        b3 = jax.random.uniform(keys[kidx], (1, num_classes), minval=-s3, maxval=s3,
                                dtype=jnp.float32); kidx += 1
        self.head_params = (w1, b1, w2, b2, w3, b3)

    @functools.partial(jax.jit, static_argnums=0)
    def __call__(self, x_enc, h0):
        """x_enc: (B, T, F) batch_first like PyTorch; h0: (n_layers, B, d_model)."""
        B, T, F = x_enc.shape
        # Pad batch to a full 8-row sublane tile so every per-step slice/store in
        # the kernel is tile-aligned (padded rows are discarded at the output).
        BP = max(8, ((B + 7) // 8) * 8)
        x_tm = jnp.transpose(x_enc, (1, 0, 2)).astype(jnp.float32)        # (T, B, F)
        x_tm = jnp.pad(x_tm, ((0, 0), (0, BP - B), (0, 0)))               # (T, BP, F)
        x_tm = x_tm.reshape(T * BP, F)                                    # row t*BP+b = x_enc[b, t]
        h0p = jnp.pad(h0.astype(jnp.float32), ((0, 0), (0, BP - B), (0, 0)))
        return fused_forward(x_tm, h0p, self.gru_params, self.head_params,
                             n_layers=self.n_layers, seq_len=T, batch=B,
                             batch_pad=BP, d_model=self.d_model,
                             num_classes=self.num_classes)


if __name__ == "__main__":
    # small config consistent with the module
    B, T, F_IN, D_MODEL, N_LAYERS, N_CLASSES = 2, 8, 4, 32, 2, 3

    key = jax.random.PRNGKey(0)
    k_param, k_x, k_h0 = jax.random.split(key, 3)

    model = GRUModelPallas(enc_in=F_IN, d_model=D_MODEL, e_layers=N_LAYERS,
                           seq_len=T, num_classes=N_CLASSES, key=k_param)

    x_enc = jax.random.normal(k_x, (B, T, F_IN), dtype=jnp.float32)
    # PyTorch uses torch.randn for h0; here generated deterministically and passed in.
    h0 = jax.random.normal(k_h0, (N_LAYERS, B, D_MODEL), dtype=jnp.float32)

    out = model(x_enc, h0)
    jax.block_until_ready(out)
    assert out.shape == (B, N_CLASSES), out.shape
    print("KERNEL_OK")
</pallas_src>

<mosaic_0001>
module attributes {stable_mosaic.version = 11 : i64} {
  func.func @kernel(%arg0: memref<64x4xf32, #tpu.memory_space<vmem>>, %arg1: memref<2x8x32xf32, #tpu.memory_space<vmem>>, %arg2: memref<4x96xf32, #tpu.memory_space<vmem>>, %arg3: memref<32x96xf32, #tpu.memory_space<vmem>>, %arg4: memref<1x96xf32, #tpu.memory_space<vmem>>, %arg5: memref<1x32xf32, #tpu.memory_space<vmem>>, %arg6: memref<32x96xf32, #tpu.memory_space<vmem>>, %arg7: memref<32x96xf32, #tpu.memory_space<vmem>>, %arg8: memref<1x96xf32, #tpu.memory_space<vmem>>, %arg9: memref<1x32xf32, #tpu.memory_space<vmem>>, %arg10: memref<256x256xf32, #tpu.memory_space<vmem>>, %arg11: memref<1x256xf32, #tpu.memory_space<vmem>>, %arg12: memref<256x64xf32, #tpu.memory_space<vmem>>, %arg13: memref<1x64xf32, #tpu.memory_space<vmem>>, %arg14: memref<64x3xf32, #tpu.memory_space<vmem>>, %arg15: memref<1x3xf32, #tpu.memory_space<vmem>>, %arg16: memref<2x3xf32, #tpu.memory_space<vmem>>, %arg17: memref<64x32xf32, #tpu.memory_space<vmem>>, %arg18: memref<8x256xf32, #tpu.memory_space<vmem>>) attributes {dimension_semantics = [], scalar_prefetch = 0 : i64, scratch_operands = 2 : i64, tpu.core_type = #tpu.core_type<tc>} {
    %c0 = arith.constant 0 : index
    %c0_0 = arith.constant 0 : index
    %0 = vector.load %arg0[%c0, %c0_0] : memref<64x4xf32, #tpu.memory_space<vmem>>, vector<64x4xf32>
    %c0_1 = arith.constant 0 : index
    %c0_2 = arith.constant 0 : index
    %1 = vector.load %arg2[%c0_1, %c0_2] : memref<4x96xf32, #tpu.memory_space<vmem>>, vector<4x96xf32>
    %cst = arith.constant dense<0.000000e+00> : vector<64x96xf32>
    %2 = tpu.matmul %0, %1, %cst {dimension_numbers = #tpu.dot_dimension_numbers<[1], [0], [0], [1], [0, 0, 1, 1], [], []>} : vector<64x4xf32>, vector<4x96xf32>, vector<64x96xf32> -> vector<64x96xf32>
    %c0_3 = arith.constant 0 : index
    %c0_4 = arith.constant 0 : index
    %3 = vector.load %arg4[%c0_3, %c0_4] : memref<1x96xf32, #tpu.memory_space<vmem>>, vector<1x96xf32>
    %4 = vector.broadcast %3 : vector<1x96xf32> to vector<64x96xf32>
    %5 = arith.addf %2, %4 : vector<64x96xf32>
    %c0_5 = arith.constant 0 : index
    %c0_6 = arith.constant 0 : index
    %6 = vector.load %arg3[%c0_5, %c0_6] : memref<32x96xf32, #tpu.memory_space<vmem>>, vector<32x96xf32>
    %c0_7 = arith.constant 0 : index
    %c0_8 = arith.constant 0 : index
    %7 = vector.load %arg5[%c0_7, %c0_8] : memref<1x32xf32, #tpu.memory_space<vmem>>, vector<1x32xf32>
    %8 = vector.shape_cast %7 : vector<1x32xf32> to vector<1x32xf32>
    %9 = vector.broadcast %8 : vector<1x32xf32> to vector<8x32xf32>
    %c0_9 = arith.constant 0 : index
    %c0_10 = arith.constant 0 : index
    %c0_11 = arith.constant 0 : index
    %10 = vector.load %arg1[%c0_9, %c0_10, %c0_11] : memref<2x8x32xf32, #tpu.memory_space<vmem>>, vector<1x8x32xf32>
    %11 = vector.shape_cast %10 : vector<1x8x32xf32> to vector<8x32xf32>
    %12 = vector.extract_strided_slice %5 {offsets = [0, 0], sizes = [8, 96], strides = [1, 1]} : vector<64x96xf32> to vector<8x96xf32>
    %cst_12 = arith.constant dense<0.000000e+00> : vector<8x96xf32>
    %13 = tpu.matmul %11, %6, %cst_12 {dimension_numbers = #tpu.dot_dimension_numbers<[1], [0], [0], [1], [0, 0, 1, 1], [], []>} : vector<8x32xf32>, vector<32x96xf32>, vector<8x96xf32> -> vector<8x96xf32>
    %14 = vector.extract_strided_slice %12 {offsets = [0, 0], sizes = [8, 32], strides = [1, 1]} : vector<8x96xf32> to vector<8x32xf32>
    %15 = vector.extract_strided_slice %13 {offsets = [0, 0], sizes = [8, 32], strides = [1, 1]} : vector<8x96xf32> to vector<8x32xf32>
    %16 = arith.addf %14, %15 : vector<8x32xf32>
    %17 = arith.negf %16 : vector<8x32xf32>
    %18 = math.exp %17 : vector<8x32xf32>
    %cst_13 = arith.constant 1.000000e+00 : f32
    %19 = vector.broadcast %cst_13 : f32 to vector<8x32xf32>
    %20 = arith.addf %19, %18 : vector<8x32xf32>
    %21 = arith.divf %19, %20 : vector<8x32xf32>
    %22 = vector.extract_strided_slice %12 {offsets = [0, 32], sizes = [8, 32], strides = [1, 1]} : vector<8x96xf32> to vector<8x32xf32>
    %23 = vector.extract_strided_slice %13 {offsets = [0, 32], sizes = [8, 32], strides = [1, 1]} : vector<8x96xf32> to vector<8x32xf32>
    %24 = arith.addf %22, %23 : vector<8x32xf32>
    %25 = arith.negf %24 : vector<8x32xf32>
    %26 = math.exp %25 : vector<8x32xf32>
    %cst_14 = arith.constant 1.000000e+00 : f32
    %27 = vector.broadcast %cst_14 : f32 to vector<8x32xf32>
    %28 = arith.addf %27, %26 : vector<8x32xf32>
    %29 = arith.divf %27, %28 : vector<8x32xf32>
    %30 = vector.extract_strided_slice %12 {offsets = [0, 64], sizes = [8, 32], strides = [1, 1]} : vector<8x96xf32> to vector<8x32xf32>
    %31 = vector.extract_strided_slice %13 {offsets = [0, 64], sizes = [8, 32], strides = [1, 1]} : vector<8x96xf32> to vector<8x32xf32>
    %32 = arith.addf %31, %9 : vector<8x32xf32>
    %33 = arith.mulf %21, %32 : vector<8x32xf32>
    %34 = arith.addf %30, %33 : vector<8x32xf32>
    %35 = math.tanh %34 : vector<8x32xf32>
    %cst_15 = arith.constant 1.000000e+00 : f32
    %36 = vector.broadcast %cst_15 : f32 to vector<8x32xf32>
    %37 = arith.subf %36, %29 : vector<8x32xf32>
    %38 = arith.mulf %37, %35 : vector<8x32xf32>
    %39 = arith.mulf %29, %11 : vector<8x32xf32>
    %40 = arith.addf %38, %39 : vector<8x32xf32>
    %c0_16 = arith.constant 0 : index
    %c0_17 = arith.constant 0 : index
    %41 = vector.load %arg17[%c0_16, %c0_17] : memref<64x32xf32, #tpu.memory_space<vmem>>, vector<8x32xf32>
    tpu.vector_store %arg17[%c0_16, %c0_17], %40 {strides = array<i32>} : memref<64x32xf32, #tpu.memory_space<vmem>>, vector<8x32xf32>,
    %42 = vector.extract_strided_slice %5 {offsets = [8, 0], sizes = [8, 96], strides = [1, 1]} : vector<64x96xf32> to vector<8x96xf32>
    %cst_18 = arith.constant dense<0.000000e+00> : vector<8x96xf32>
    %43 = tpu.matmul %40, %6, %cst_18 {dimension_numbers = #tpu.dot_dimension_numbers<[1], [0], [0], [1], [0, 0, 1, 1], [], []>} : vector<8x32xf32>, vector<32x96xf32>, vector<8x96xf32> -> vector<8x96xf32>
    %44 = vector.extract_strided_slice %42 {offsets = [0, 0], sizes = [8, 32], strides = [1, 1]} : vector<8x96xf32> to vector<8x32xf32>
    %45 = vector.extract_strided_slice %43 {offsets = [0, 0], sizes = [8, 32], strides = [1, 1]} : vector<8x96xf32> to vector<8x32xf32>
    %46 = arith.addf %44, %45 : vector<8x32xf32>
    %47 = arith.negf %46 : vector<8x32xf32>
    %48 = math.exp %47 : vector<8x32xf32>
    %cst_19 = arith.constant 1.000000e+00 : f32
    %49 = vector.broadcast %cst_19 : f32 to vector<8x32xf32>
    %50 = arith.addf %49, %48 : vector<8x32xf32>
    %51 = arith.divf %49, %50 : vector<8x32xf32>
    %52 = vector.extract_strided_slice %42 {offsets = [0, 32], sizes = [8, 32], strides = [1, 1]} : vector<8x96xf32> to vector<8x32xf32>
    %53 = vector.extract_strided_slice %43 {offsets = [0, 32], sizes = [8, 32], strides = [1, 1]} : vector<8x96xf32> to vector<8x32xf32>
    %54 = arith.addf %52, %53 : vector<8x32xf32>
    %55 = arith.negf %54 : vector<8x32xf32>
    %56 = math.exp %55 : vector<8x32xf32>
    %cst_20 = arith.constant 1.000000e+00 : f32
    %57 = vector.broadcast %cst_20 : f32 to vector<8x32xf32>
    %58 = arith.addf %57, %56 : vector<8x32xf32>
    %59 = arith.divf %57, %58 : vector<8x32xf32>
    %60 = vector.extract_strided_slice %42 {offsets = [0, 64], sizes = [8, 32], strides = [1, 1]} : vector<8x96xf32> to vector<8x32xf32>
    %61 = vector.extract_strided_slice %43 {offsets = [0, 64], sizes = [8, 32], strides = [1, 1]} : vector<8x96xf32> to vector<8x32xf32>
    %62 = arith.addf %61, %9 : vector<8x32xf32>
    %63 = arith.mulf %51, %62 : vector<8x32xf32>
    %64 = arith.addf %60, %63 : vector<8x32xf32>
    %65 = math.tanh %64 : vector<8x32xf32>
    %cst_21 = arith.constant 1.000000e+00 : f32
    %66 = vector.broadcast %cst_21 : f32 to vector<8x32xf32>
    %67 = arith.subf %66, %59 : vector<8x32xf32>
    %68 = arith.mulf %67, %65 : vector<8x32xf32>
    %69 = arith.mulf %59, %40 : vector<8x32xf32>
    %70 = arith.addf %68, %69 : vector<8x32xf32>
    %c8 = arith.constant 8 : index
    %c0_22 = arith.constant 0 : index
    %71 = vector.load %arg17[%c8, %c0_22] : memref<64x32xf32, #tpu.memory_space<vmem>>, vector<8x32xf32>
    tpu.vector_store %arg17[%c8, %c0_22], %70 {strides = array<i32>} : memref<64x32xf32, #tpu.memory_space<vmem>>, vector<8x32xf32>,
    %72 = vector.extract_strided_slice %5 {offsets = [16, 0], sizes = [8, 96], strides = [1, 1]} : vector<64x96xf32> to vector<8x96xf32>
    %cst_23 = arith.constant dense<0.000000e+00> : vector<8x96xf32>
    %73 = tpu.matmul %70, %6, %cst_23 {dimension_numbers = #tpu.dot_dimension_numbers<[1], [0], [0], [1], [0, 0, 1, 1], [], []>} : vector<8x32xf32>, vector<32x96xf32>, vector<8x96xf32> -> vector<8x96xf32>
    %74 = vector.extract_strided_slice %72 {offsets = [0, 0], sizes = [8, 32], strides = [1, 1]} : vector<8x96xf32> to vector<8x32xf32>
    %75 = vector.extract_strided_slice %73 {offsets = [0, 0], sizes = [8, 32], strides = [1, 1]} : vector<8x96xf32> to vector<8x32xf32>
    %76 = arith.addf %74, %75 : vector<8x32xf32>
    %77 = arith.negf %76 : vector<8x32xf32>
    %78 = math.exp %77 : vector<8x32xf32>
    %cst_24 = arith.constant 1.000000e+00 : f32
    %79 = vector.broadcast %cst_24 : f32 to vector<8x32xf32>
    %80 = arith.addf %79, %78 : vector<8x32xf32>
    %81 = arith.divf %79, %80 : vector<8x32xf32>
    %82 = vector.extract_strided_slice %72 {offsets = [0, 32], sizes = [8, 32], strides = [1, 1]} : vector<8x96xf32> to vector<8x32xf32>
    %83 = vector.extract_strided_slice %73 {offsets = [0, 32], sizes = [8, 32], strides = [1, 1]} : vector<8x96xf32> to vector<8x32xf32>
    %84 = arith.addf %82, %83 : vector<8x32xf32>
    %85 = arith.negf %84 : vector<8x32xf32>
    %86 = math.exp %85 : vector<8x32xf32>
    %cst_25 = arith.constant 1.000000e+00 : f32
    %87 = vector.broadcast %cst_25 : f32 to vector<8x32xf32>
    %88 = arith.addf %87, %86 : vector<8x32xf32>
    %89 = arith.divf %87, %88 : vector<8x32xf32>
    %90 = vector.extract_strided_slice %72 {offsets = [0, 64], sizes = [8, 32], strides = [1, 1]} : vector<8x96xf32> to vector<8x32xf32>
    %91 = vector.extract_strided_slice %73 {offsets = [0, 64], sizes = [8, 32], strides = [1, 1]} : vector<8x96xf32> to vector<8x32xf32>
    %92 = arith.addf %91, %9 : vector<8x32xf32>
    %93 = arith.mulf %81, %92 : vector<8x32xf32>
    %94 = arith.addf %90, %93 : vector<8x32xf32>
    %95 = math.tanh %94 : vector<8x32xf32>
    %cst_26 = arith.constant 1.000000e+00 : f32
    %96 = vector.broadcast %cst_26 : f32 to vector<8x32xf32>
    %97 = arith.subf %96, %89 : vector<8x32xf32>
    %98 = arith.mulf %97, %95 : vector<8x32xf32>
    %99 = arith.mulf %89, %70 : vector<8x32xf32>
    %100 = arith.addf %98, %99 : vector<8x32xf32>
    %c16 = arith.constant 16 : index
    %c0_27 = arith.constant 0 : index
    %101 = vector.load %arg17[%c16, %c0_27] : memref<64x32xf32, #tpu.memory_space<vmem>>, vector<8x32xf32>
    tpu.vector_store %arg17[%c16, %c0_27], %100 {strides = array<i32>} : memref<64x32xf32, #tpu.memory_space<vmem>>, vector<8x32xf32>,
    %102 = vector.extract_strided_slice %5 {offsets = [24, 0], sizes = [8, 96], strides = [1, 1]} : vector<64x96xf32> to vector<8x96xf32>
    %cst_28 = arith.constant dense<0.000000e+00> : vector<8x96xf32>
    %103 = tpu.matmul %100, %6, %cst_28 {dimension_numbers = #tpu.dot_dimension_numbers<[1], [0], [0], [1], [0, 0, 1, 1], [], []>} : vector<8x32xf32>, vector<32x96xf32>, vector<8x96xf32> -> vector<8x96xf32>
    %104 = vector.extract_strided_slice %102 {offsets = [0, 0], sizes = [8, 32], strides = [1, 1]} : vector<8x96xf32> to vector<8x32xf32>
    %105 = vector.extract_strided_slice %103 {offsets = [0, 0], sizes = [8, 32], strides = [1, 1]} : vector<8x96xf32> to vector<8x32xf32>
    %106 = arith.addf %104, %105 : vector<8x32xf32>
    %107 = arith.negf %106 : vector<8x32xf32>
    %108 = math.exp %107 : vector<8x32xf32>
    %cst_29 = arith.constant 1.000000e+00 : f32
    %109 = vector.broadcast %cst_29 : f32 to vector<8x32xf32>
    %110 = arith.addf %109, %108 : vector<8x32xf32>
    %111 = arith.divf %109, %110 : vector<8x32xf32>
    %112 = vector.extract_strided_slice %102 {offsets = [0, 32], sizes = [8, 32], strides = [1, 1]} : vector<8x96xf32> to vector<8x32xf32>
    %113 = vector.extract_strided_slice %103 {offsets = [0, 32], sizes = [8, 32], strides = [1, 1]} : vector<8x96xf32> to vector<8x32xf32>
    %114 = arith.addf %112, %113 : vector<8x32xf32>
    %115 = arith.negf %114 : vector<8x32xf32>
    %116 = math.exp %115 : vector<8x32xf32>
    %cst_30 = arith.constant 1.000000e+00 : f32
    %117 = vector.broadcast %cst_30 : f32 to vector<8x32xf32>
    %118 = arith.addf %117, %116 : vector<8x32xf32>
    %119 = arith.divf %117, %118 : vector<8x32xf32>
    %120 = vector.extract_strided_slice %102 {offsets = [0, 64], sizes = [8, 32], strides = [1, 1]} : vector<8x96xf32> to vector<8x32xf32>
    %121 = vector.extract_strided_slice %103 {offsets = [0, 64], sizes = [8, 32], strides = [1, 1]} : vector<8x96xf32> to vector<8x32xf32>
    %122 = arith.addf %121, %9 : vector<8x32xf32>
    %123 = arith.mulf %111, %122 : vector<8x32xf32>
    %124 = arith.addf %120, %123 : vector<8x32xf32>
    %125 = math.tanh %124 : vector<8x32xf32>
    %cst_31 = arith.constant 1.000000e+00 : f32
    %126 = vector.broadcast %cst_31 : f32 to vector<8x32xf32>
    %127 = arith.subf %126, %119 : vector<8x32xf32>
    %128 = arith.mulf %127, %125 : vector<8x32xf32>
    %129 = arith.mulf %119, %100 : vector<8x32xf32>
    %130 = arith.addf %128, %129 : vector<8x32xf32>
    %c24 = arith.constant 24 : index
    %c0_32 = arith.constant 0 : index
    %131 = vector.load %arg17[%c24, %c0_32] : memref<64x32xf32, #tpu.memory_space<vmem>>, vector<8x32xf32>
    tpu.vector_store %arg17[%c24, %c0_32], %130 {strides = array<i32>} : memref<64x32xf32, #tpu.memory_space<vmem>>, vector<8x32xf32>,
    %132 = vector.extract_strided_slice %5 {offsets = [32, 0], sizes = [8, 96], strides = [1, 1]} : vector<64x96xf32> to vector<8x96xf32>
    %cst_33 = arith.constant dense<0.000000e+00> : vector<8x96xf32>
    %133 = tpu.matmul %130, %6, %cst_33 {dimension_numbers = #tpu.dot_dimension_numbers<[1], [0], [0], [1], [0, 0, 1, 1], [], []>} : vector<8x32xf32>, vector<32x96xf32>, vector<8x96xf32> -> vector<8x96xf32>
    %134 = vector.extract_strided_slice %132 {offsets = [0, 0], sizes = [8, 32], strides = [1, 1]} : vector<8x96xf32> to vector<8x32xf32>
    %135 = vector.extract_strided_slice %133 {offsets = [0, 0], sizes = [8, 32], strides = [1, 1]} : vector<8x96xf32> to vector<8x32xf32>
    %136 = arith.addf %134, %135 : vector<8x32xf32>
    %137 = arith.negf %136 : vector<8x32xf32>
    %138 = math.exp %137 : vector<8x32xf32>
    %cst_34 = arith.constant 1.000000e+00 : f32
    %139 = vector.broadcast %cst_34 : f32 to vector<8x32xf32>
    %140 = arith.addf %139, %138 : vector<8x32xf32>
    %141 = arith.divf %139, %140 : vector<8x32xf32>
    %142 = vector.extract_strided_slice %132 {offsets = [0, 32], sizes = [8, 32], strides = [1, 1]} : vector<8x96xf32> to vector<8x32xf32>
    %143 = vector.extract_strided_slice %133 {offsets = [0, 32], sizes = [8, 32], strides = [1, 1]} : vector<8x96xf32> to vector<8x32xf32>
    %144 = arith.addf %142, %143 : vector<8x32xf32>
    %145 = arith.negf %144 : vector<8x32xf32>
    %146 = math.exp %145 : vector<8x32xf32>
    %cst_35 = arith.constant 1.000000e+00 : f32
    %147 = vector.broadcast %cst_35 : f32 to vector<8x32xf32>
    %148 = arith.addf %147, %146 : vector<8x32xf32>
    %149 = arith.divf %147, %148 : vector<8x32xf32>
    %150 = vector.extract_strided_slice %132 {offsets = [0, 64], sizes = [8, 32], strides = [1, 1]} : vector<8x96xf32> to vector<8x32xf32>
    %151 = vector.extract_strided_slice %133 {offsets = [0, 64], sizes = [8, 32], strides = [1, 1]} : vector<8x96xf32> to vector<8x32xf32>
    %152 = arith.addf %151, %9 : vector<8x32xf32>
    %153 = arith.mulf %141, %152 : vector<8x32xf32>
    %154 = arith.addf %150, %153 : vector<8x32xf32>
    %155 = math.tanh %154 : vector<8x32xf32>
    %cst_36 = arith.constant 1.000000e+00 : f32
    %156 = vector.broadcast %cst_36 : f32 to vector<8x32xf32>
    %157 = arith.subf %156, %149 : vector<8x32xf32>
    %158 = arith.mulf %157, %155 : vector<8x32xf32>
    %159 = arith.mulf %149, %130 : vector<8x32xf32>
    %160 = arith.addf %158, %159 : vector<8x32xf32>
    %c32 = arith.constant 32 : index
    %c0_37 = arith.constant 0 : index
    %161 = vector.load %arg17[%c32, %c0_37] : memref<64x32xf32, #tpu.memory_space<vmem>>, vector<8x32xf32>
    tpu.vector_store %arg17[%c32, %c0_37], %160 {strides = array<i32>} : memref<64x32xf32, #tpu.memory_space<vmem>>, vector<8x32xf32>,
    %162 = vector.extract_strided_slice %5 {offsets = [40, 0], sizes = [8, 96], strides = [1, 1]} : vector<64x96xf32> to vector<8x96xf32>
    %cst_38 = arith.constant dense<0.000000e+00> : vector<8x96xf32>
    %163 = tpu.matmul %160, %6, %cst_38 {dimension_numbers = #tpu.dot_dimension_numbers<[1], [0], [0], [1], [0, 0, 1, 1], [], []>} : vector<8x32xf32>, vector<32x96xf32>, vector<8x96xf32> -> vector<8x96xf32>
    %164 = vector.extract_strided_slice %162 {offsets = [0, 0], sizes = [8, 32], strides = [1, 1]} : vector<8x96xf32> to vector<8x32xf32>
    %165 = vector.extract_strided_slice %163 {offsets = [0, 0], sizes = [8, 32], strides = [1, 1]} : vector<8x96xf32> to vector<8x32xf32>
    %166 = arith.addf %164, %165 : vector<8x32xf32>
    %167 = arith.negf %166 : vector<8x32xf32>
    %168 = math.exp %167 : vector<8x32xf32>
    %cst_39 = arith.constant 1.000000e+00 : f32
    %169 = vector.broadcast %cst_39 : f32 to vector<8x32xf32>
    %170 = arith.addf %169, %168 : vector<8x32xf32>
    %171 = arith.divf %169, %170 : vector<8x32xf32>
    %172 = vector.extract_strided_slice %162 {offsets = [0, 32], sizes = [8, 32], strides = [1, 1]} : vector<8x96xf32> to vector<8x32xf32>
    %173 = vector.extract_strided_slice %163 {offsets = [0, 32], sizes = [8, 32], strides = [1, 1]} : vector<8x96xf32> to vector<8x32xf32>
    %174 = arith.addf %172, %173 : vector<8x32xf32>
    %175 = arith.negf %174 : vector<8x32xf32>
    %176 = math.exp %175 : vector<8x32xf32>
    %cst_40 = arith.constant 1.000000e+00 : f32
    %177 = vector.broadcast %cst_40 : f32 to vector<8x32xf32>
    %178 = arith.addf %177, %176 : vector<8x32xf32>
    %179 = arith.divf %177, %178 : vector<8x32xf32>
    %180 = vector.extract_strided_slice %162 {offsets = [0, 64], sizes = [8, 32], strides = [1, 1]} : vector<8x96xf32> to vector<8x32xf32>
    %181 = vector.extract_strided_slice %163 {offsets = [0, 64], sizes = [8, 32], strides = [1, 1]} : vector<8x96xf32> to vector<8x32xf32>
    %182 = arith.addf %181, %9 : vector<8x32xf32>
    %183 = arith.mulf %171, %182 : vector<8x32xf32>
    %184 = arith.addf %180, %183 : vector<8x32xf32>
    %185 = math.tanh %184 : vector<8x32xf32>
    %cst_41 = arith.constant 1.000000e+00 : f32
    %186 = vector.broadcast %cst_41 : f32 to vector<8x32xf32>
    %187 = arith.subf %186, %179 : vector<8x32xf32>
    %188 = arith.mulf %187, %185 : vector<8x32xf32>
    %189 = arith.mulf %179, %160 : vector<8x32xf32>
    %190 = arith.addf %188, %189 : vector<8x32xf32>
    %c40 = arith.constant 40 : index
    %c0_42 = arith.constant 0 : index
    %191 = vector.load %arg17[%c40, %c0_42] : memref<64x32xf32, #tpu.memory_space<vmem>>, vector<8x32xf32>
    tpu.vector_store %arg17[%c40, %c0_42], %190 {strides = array<i32>} : memref<64x32xf32, #tpu.memory_space<vmem>>, vector<8x32xf32>,
    %192 = vector.extract_strided_slice %5 {offsets = [48, 0], sizes = [8, 96], strides = [1, 1]} : vector<64x96xf32> to vector<8x96xf32>
    %cst_43 = arith.constant dense<0.000000e+00> : vector<8x96xf32>
    %193 = tpu.matmul %190, %6, %cst_43 {dimension_numbers = #tpu.dot_dimension_numbers<[1], [0], [0], [1], [0, 0, 1, 1], [], []>} : vector<8x32xf32>, vector<32x96xf32>, vector<8x96xf32> -> vector<8x96xf32>
    %194 = vector.extract_strided_slice %192 {offsets = [0, 0], sizes = [8, 32], strides = [1, 1]} : vector<8x96xf32> to vector<8x32xf32>
    %195 = vector.extract_strided_slice %193 {offsets = [0, 0], sizes = [8, 32], strides = [1, 1]} : vector<8x96xf32> to vector<8x32xf32>
    %196 = arith.addf %194, %195 : vector<8x32xf32>
    %197 = arith.negf %196 : vector<8x32xf32>
    %198 = math.exp %197 : vector<8x32xf32>
    %cst_44 = arith.constant 1.000000e+00 : f32
    %199 = vector.broadcast %cst_44 : f32 to vector<8x32xf32>
    %200 = arith.addf %199, %198 : vector<8x32xf32>
    %201 = arith.divf %199, %200 : vector<8x32xf32>
    %202 = vector.extract_strided_slice %192 {offsets = [0, 32], sizes = [8, 32], strides = [1, 1]} : vector<8x96xf32> to vector<8x32xf32>
    %203 = vector.extract_strided_slice %193 {offsets = [0, 32], sizes = [8, 32], strides = [1, 1]} : vector<8x96xf32> to vector<8x32xf32>
    %204 = arith.addf %202, %203 : vector<8x32xf32>
    %205 = arith.negf %204 : vector<8x32xf32>
    %206 = math.exp %205 : vector<8x32xf32>
    %cst_45 = arith.constant 1.000000e+00 : f32
    %207 = vector.broadcast %cst_45 : f32 to vector<8x32xf32>
    %208 = arith.addf %207, %206 : vector<8x32xf32>
    %209 = arith.divf %207, %208 : vector<8x32xf32>
    %210 = vector.extract_strided_slice %192 {offsets = [0, 64], sizes = [8, 32], strides = [1, 1]} : vector<8x96xf32> to vector<8x32xf32>
    %211 = vector.extract_strided_slice %193 {offsets = [0, 64], sizes = [8, 32], strides = [1, 1]} : vector<8x96xf32> to vector<8x32xf32>
    %212 = arith.addf %211, %9 : vector<8x32xf32>
    %213 = arith.mulf %201, %212 : vector<8x32xf32>
    %214 = arith.addf %210, %213 : vector<8x32xf32>
    %215 = math.tanh %214 : vector<8x32xf32>
    %cst_46 = arith.constant 1.000000e+00 : f32
    %216 = vector.broadcast %cst_46 : f32 to vector<8x32xf32>
    %217 = arith.subf %216, %209 : vector<8x32xf32>
    %218 = arith.mulf %217, %215 : vector<8x32xf32>
    %219 = arith.mulf %209, %190 : vector<8x32xf32>
    %220 = arith.addf %218, %219 : vector<8x32xf32>
    %c48 = arith.constant 48 : index
    %c0_47 = arith.constant 0 : index
    %221 = vector.load %arg17[%c48, %c0_47] : memref<64x32xf32, #tpu.memory_space<vmem>>, vector<8x32xf32>
    tpu.vector_store %arg17[%c48, %c0_47], %220 {strides = array<i32>} : memref<64x32xf32, #tpu.memory_space<vmem>>, vector<8x32xf32>,
    %222 = vector.extract_strided_slice %5 {offsets = [56, 0], sizes = [8, 96], strides = [1, 1]} : vector<64x96xf32> to vector<8x96xf32>
    %cst_48 = arith.constant dense<0.000000e+00> : vector<8x96xf32>
    %223 = tpu.matmul %220, %6, %cst_48 {dimension_numbers = #tpu.dot_dimension_numbers<[1], [0], [0], [1], [0, 0, 1, 1], [], []>} : vector<8x32xf32>, vector<32x96xf32>, vector<8x96xf32> -> vector<8x96xf32>
    %224 = vector.extract_strided_slice %222 {offsets = [0, 0], sizes = [8, 32], strides = [1, 1]} : vector<8x96xf32> to vector<8x32xf32>
    %225 = vector.extract_strided_slice %223 {offsets = [0, 0], sizes = [8, 32], strides = [1, 1]} : vector<8x96xf32> to vector<8x32xf32>
    %226 = arith.addf %224, %225 : vector<8x32xf32>
    %227 = arith.negf %226 : vector<8x32xf32>
    %228 = math.exp %227 : vector<8x32xf32>
    %cst_49 = arith.constant 1.000000e+00 : f32
    %229 = vector.broadcast %cst_49 : f32 to vector<8x32xf32>
    %230 = arith.addf %229, %228 : vector<8x32xf32>
    %231 = arith.divf %229, %230 : vector<8x32xf32>
    %232 = vector.extract_strided_slice %222 {offsets = [0, 32], sizes = [8, 32], strides = [1, 1]} : vector<8x96xf32> to vector<8x32xf32>
    %233 = vector.extract_strided_slice %223 {offsets = [0, 32], sizes = [8, 32], strides = [1, 1]} : vector<8x96xf32> to vector<8x32xf32>
    %234 = arith.addf %232, %233 : vector<8x32xf32>
    %235 = arith.negf %234 : vector<8x32xf32>
    %236 = math.exp %235 : vector<8x32xf32>
    %cst_50 = arith.constant 1.000000e+00 : f32
    %237 = vector.broadcast %cst_50 : f32 to vector<8x32xf32>
    %238 = arith.addf %237, %236 : vector<8x32xf32>
    %239 = arith.divf %237, %238 : vector<8x32xf32>
    %240 = vector.extract_strided_slice %222 {offsets = [0, 64], sizes = [8, 32], strides = [1, 1]} : vector<8x96xf32> to vector<8x32xf32>
    %241 = vector.extract_strided_slice %223 {offsets = [0, 64], sizes = [8, 32], strides = [1, 1]} : vector<8x96xf32> to vector<8x32xf32>
    %242 = arith.addf %241, %9 : vector<8x32xf32>
    %243 = arith.mulf %231, %242 : vector<8x32xf32>
    %244 = arith.addf %240, %243 : vector<8x32xf32>
    %245 = math.tanh %244 : vector<8x32xf32>
    %cst_51 = arith.constant 1.000000e+00 : f32
    %246 = vector.broadcast %cst_51 : f32 to vector<8x32xf32>
    %247 = arith.subf %246, %239 : vector<8x32xf32>
    %248 = arith.mulf %247, %245 : vector<8x32xf32>
    %249 = arith.mulf %239, %220 : vector<8x32xf32>
    %250 = arith.addf %248, %249 : vector<8x32xf32>
    %c56 = arith.constant 56 : index
    %c0_52 = arith.constant 0 : index
    %251 = vector.load %arg17[%c56, %c0_52] : memref<64x32xf32, #tpu.memory_space<vmem>>, vector<8x32xf32>
    tpu.vector_store %arg17[%c56, %c0_52], %250 {strides = array<i32>} : memref<64x32xf32, #tpu.memory_space<vmem>>, vector<8x32xf32>,
    %c0_53 = arith.constant 0 : index
    %c0_54 = arith.constant 0 : index
    %252 = vector.load %arg17[%c0_53, %c0_54] : memref<64x32xf32, #tpu.memory_space<vmem>>, vector<64x32xf32>
    %c0_55 = arith.constant 0 : index
    %c0_56 = arith.constant 0 : index
    %253 = vector.load %arg6[%c0_55, %c0_56] : memref<32x96xf32, #tpu.memory_space<vmem>>, vector<32x96xf32>
    %cst_57 = arith.constant dense<0.000000e+00> : vector<64x96xf32>
    %254 = tpu.matmul %252, %253, %cst_57 {dimension_numbers = #tpu.dot_dimension_numbers<[1], [0], [0], [1], [0, 0, 1, 1], [], []>} : vector<64x32xf32>, vector<32x96xf32>, vector<64x96xf32> -> vector<64x96xf32>
    %c0_58 = arith.constant 0 : index
    %c0_59 = arith.constant 0 : index
    %255 = vector.load %arg8[%c0_58, %c0_59] : memref<1x96xf32, #tpu.memory_space<vmem>>, vector<1x96xf32>
    %256 = vector.broadcast %255 : vector<1x96xf32> to vector<64x96xf32>
    %257 = arith.addf %254, %256 : vector<64x96xf32>
    %c0_60 = arith.constant 0 : index
    %c0_61 = arith.constant 0 : index
    %258 = vector.load %arg7[%c0_60, %c0_61] : memref<32x96xf32, #tpu.memory_space<vmem>>, vector<32x96xf32>
    %c0_62 = arith.constant 0 : index
    %c0_63 = arith.constant 0 : index
    %259 = vector.load %arg9[%c0_62, %c0_63] : memref<1x32xf32, #tpu.memory_space<vmem>>, vector<1x32xf32>
    %260 = vector.shape_cast %259 : vector<1x32xf32> to vector<1x32xf32>
    %261 = vector.broadcast %260 : vector<1x32xf32> to vector<8x32xf32>
    %c1 = arith.constant 1 : index
    %c0_64 = arith.constant 0 : index
    %c0_65 = arith.constant 0 : index
    %262 = vector.load %arg1[%c1, %c0_64, %c0_65] : memref<2x8x32xf32, #tpu.memory_space<vmem>>, vector<1x8x32xf32>
    %263 = vector.shape_cast %262 : vector<1x8x32xf32> to vector<8x32xf32>
    %264 = vector.extract_strided_slice %257 {offsets = [0, 0], sizes = [8, 96], strides = [1, 1]} : vector<64x96xf32> to vector<8x96xf32>
    %cst_66 = arith.constant dense<0.000000e+00> : vector<8x96xf32>
    %265 = tpu.matmul %263, %258, %cst_66 {dimension_numbers = #tpu.dot_dimension_numbers<[1], [0], [0], [1], [0, 0, 1, 1], [], []>} : vector<8x32xf32>, vector<32x96xf32>, vector<8x96xf32> -> vector<8x96xf32>
    %266 = vector.extract_strided_slice %264 {offsets = [0, 0], sizes = [8, 32], strides = [1, 1]} : vector<8x96xf32> to vector<8x32xf32>
    %267 = vector.extract_strided_slice %265 {offsets = [0, 0], sizes = [8, 32], strides = [1, 1]} : vector<8x96xf32> to vector<8x32xf32>
    %268 = arith.addf %266, %267 : vector<8x32xf32>
    %269 = arith.negf %268 : vector<8x32xf32>
    %270 = math.exp %269 : vector<8x32xf32>
    %cst_67 = arith.constant 1.000000e+00 : f32
    %271 = vector.broadcast %cst_67 : f32 to vector<8x32xf32>
    %272 = arith.addf %271, %270 : vector<8x32xf32>
    %273 = arith.divf %271, %272 : vector<8x32xf32>
    %274 = vector.extract_strided_slice %264 {offsets = [0, 32], sizes = [8, 32], strides = [1, 1]} : vector<8x96xf32> to vector<8x32xf32>
    %275 = vector.extract_strided_slice %265 {offsets = [0, 32], sizes = [8, 32], strides = [1, 1]} : vector<8x96xf32> to vector<8x32xf32>
    %276 = arith.addf %274, %275 : vector<8x32xf32>
    %277 = arith.negf %276 : vector<8x32xf32>
    %278 = math.exp %277 : vector<8x32xf32>
    %cst_68 = arith.constant 1.000000e+00 : f32
    %279 = vector.broadcast %cst_68 : f32 to vector<8x32xf32>
    %280 = arith.addf %279, %278 : vector<8x32xf32>
    %281 = arith.divf %279, %280 : vector<8x32xf32>
    %282 = vector.extract_strided_slice %264 {offsets = [0, 64], sizes = [8, 32], strides = [1, 1]} : vector<8x96xf32> to vector<8x32xf32>
    %283 = vector.extract_strided_slice %265 {offsets = [0, 64], sizes = [8, 32], strides = [1, 1]} : vector<8x96xf32> to vector<8x32xf32>
    %284 = arith.addf %283, %261 : vector<8x32xf32>
    %285 = arith.mulf %273, %284 : vector<8x32xf32>
    %286 = arith.addf %282, %285 : vector<8x32xf32>
    %287 = math.tanh %286 : vector<8x32xf32>
    %cst_69 = arith.constant 1.000000e+00 : f32
    %288 = vector.broadcast %cst_69 : f32 to vector<8x32xf32>
    %289 = arith.subf %288, %281 : vector<8x32xf32>
    %290 = arith.mulf %289, %287 : vector<8x32xf32>
    %291 = arith.mulf %281, %263 : vector<8x32xf32>
    %292 = arith.addf %290, %291 : vector<8x32xf32>
    %c0_70 = arith.constant 0 : index
    %c0_71 = arith.constant 0 : index
    %293 = vector.load %arg18[%c0_70, %c0_71] : memref<8x256xf32, #tpu.memory_space<vmem>>, vector<8x32xf32>
    tpu.vector_store %arg18[%c0_70, %c0_71], %292 {strides = array<i32>} : memref<8x256xf32, #tpu.memory_space<vmem>>, vector<8x32xf32>,
    %294 = vector.extract_strided_slice %257 {offsets = [8, 0], sizes = [8, 96], strides = [1, 1]} : vector<64x96xf32> to vector<8x96xf32>
    %cst_72 = arith.constant dense<0.000000e+00> : vector<8x96xf32>
    %295 = tpu.matmul %292, %258, %cst_72 {dimension_numbers = #tpu.dot_dimension_numbers<[1], [0], [0], [1], [0, 0, 1, 1], [], []>} : vector<8x32xf32>, vector<32x96xf32>, vector<8x96xf32> -> vector<8x96xf32>
    %296 = vector.extract_strided_slice %294 {offsets = [0, 0], sizes = [8, 32], strides = [1, 1]} : vector<8x96xf32> to vector<8x32xf32>
    %297 = vector.extract_strided_slice %295 {offsets = [0, 0], sizes = [8, 32], strides = [1, 1]} : vector<8x96xf32> to vector<8x32xf32>
    %298 = arith.addf %296, %297 : vector<8x32xf32>
    %299 = arith.negf %298 : vector<8x32xf32>
    %300 = math.exp %299 : vector<8x32xf32>
    %cst_73 = arith.constant 1.000000e+00 : f32
    %301 = vector.broadcast %cst_73 : f32 to vector<8x32xf32>
    %302 = arith.addf %301, %300 : vector<8x32xf32>
    %303 = arith.divf %301, %302 : vector<8x32xf32>
    %304 = vector.extract_strided_slice %294 {offsets = [0, 32], sizes = [8, 32], strides = [1, 1]} : vector<8x96xf32> to vector<8x32xf32>
    %305 = vector.extract_strided_slice %295 {offsets = [0, 32], sizes = [8, 32], strides = [1, 1]} : vector<8x96xf32> to vector<8x32xf32>
    %306 = arith.addf %304, %305 : vector<8x32xf32>
    %307 = arith.negf %306 : vector<8x32xf32>
    %308 = math.exp %307 : vector<8x32xf32>
    %cst_74 = arith.constant 1.000000e+00 : f32
    %309 = vector.broadcast %cst_74 : f32 to vector<8x32xf32>
    %310 = arith.addf %309, %308 : vector<8x32xf32>
    %311 = arith.divf %309, %310 : vector<8x32xf32>
    %312 = vector.extract_strided_slice %294 {offsets = [0, 64], sizes = [8, 32], strides = [1, 1]} : vector<8x96xf32> to vector<8x32xf32>
    %313 = vector.extract_strided_slice %295 {offsets = [0, 64], sizes = [8, 32], strides = [1, 1]} : vector<8x96xf32> to vector<8x32xf32>
    %314 = arith.addf %313, %261 : vector<8x32xf32>
    %315 = arith.mulf %303, %314 : vector<8x32xf32>
    %316 = arith.addf %312, %315 : vector<8x32xf32>
    %317 = math.tanh %316 : vector<8x32xf32>
    %cst_75 = arith.constant 1.000000e+00 : f32
    %318 = vector.broadcast %cst_75 : f32 to vector<8x32xf32>
    %319 = arith.subf %318, %311 : vector<8x32xf32>
    %320 = arith.mulf %319, %317 : vector<8x32xf32>
    %321 = arith.mulf %311, %292 : vector<8x32xf32>
    %322 = arith.addf %320, %321 : vector<8x32xf32>
    %c0_76 = arith.constant 0 : index
    %c32_77 = arith.constant 32 : index
    %323 = vector.load %arg18[%c0_76, %c32_77] : memref<8x256xf32, #tpu.memory_space<vmem>>, vector<8x32xf32>
    tpu.vector_store %arg18[%c0_76, %c32_77], %322 {strides = array<i32>} : memref<8x256xf32, #tpu.memory_space<vmem>>, vector<8x32xf32>,
    %324 = vector.extract_strided_slice %257 {offsets = [16, 0], sizes = [8, 96], strides = [1, 1]} : vector<64x96xf32> to vector<8x96xf32>
    %cst_78 = arith.constant dense<0.000000e+00> : vector<8x96xf32>
    %325 = tpu.matmul %322, %258, %cst_78 {dimension_numbers = #tpu.dot_dimension_numbers<[1], [0], [0], [1], [0, 0, 1, 1], [], []>} : vector<8x32xf32>, vector<32x96xf32>, vector<8x96xf32> -> vector<8x96xf32>
    %326 = vector.extract_strided_slice %324 {offsets = [0, 0], sizes = [8, 32], strides = [1, 1]} : vector<8x96xf32> to vector<8x32xf32>
    %327 = vector.extract_strided_slice %325 {offsets = [0, 0], sizes = [8, 32], strides = [1, 1]} : vector<8x96xf32> to vector<8x32xf32>
    %328 = arith.addf %326, %327 : vector<8x32xf32>
    %329 = arith.negf %328 : vector<8x32xf32>
    %330 = math.exp %329 : vector<8x32xf32>
    %cst_79 = arith.constant 1.000000e+00 : f32
    %331 = vector.broadcast %cst_79 : f32 to vector<8x32xf32>
    %332 = arith.addf %331, %330 : vector<8x32xf32>
    %333 = arith.divf %331, %332 : vector<8x32xf32>
    %334 = vector.extract_strided_slice %324 {offsets = [0, 32], sizes = [8, 32], strides = [1, 1]} : vector<8x96xf32> to vector<8x32xf32>
    %335 = vector.extract_strided_slice %325 {offsets = [0, 32], sizes = [8, 32], strides = [1, 1]} : vector<8x96xf32> to vector<8x32xf32>
    %336 = arith.addf %334, %335 : vector<8x32xf32>
    %337 = arith.negf %336 : vector<8x32xf32>
    %338 = math.exp %337 : vector<8x32xf32>
    %cst_80 = arith.constant 1.000000e+00 : f32
    %339 = vector.broadcast %cst_80 : f32 to vector<8x32xf32>
    %340 = arith.addf %339, %338 : vector<8x32xf32>
    %341 = arith.divf %339, %340 : vector<8x32xf32>
    %342 = vector.extract_strided_slice %324 {offsets = [0, 64], sizes = [8, 32], strides = [1, 1]} : vector<8x96xf32> to vector<8x32xf32>
    %343 = vector.extract_strided_slice %325 {offsets = [0, 64], sizes = [8, 32], strides = [1, 1]} : vector<8x96xf32> to vector<8x32xf32>
    %344 = arith.addf %343, %261 : vector<8x32xf32>
    %345 = arith.mulf %333, %344 : vector<8x32xf32>
    %346 = arith.addf %342, %345 : vector<8x32xf32>
    %347 = math.tanh %346 : vector<8x32xf32>
    %cst_81 = arith.constant 1.000000e+00 : f32
    %348 = vector.broadcast %cst_81 : f32 to vector<8x32xf32>
    %349 = arith.subf %348, %341 : vector<8x32xf32>
    %350 = arith.mulf %349, %347 : vector<8x32xf32>
    %351 = arith.mulf %341, %322 : vector<8x32xf32>
    %352 = arith.addf %350, %351 : vector<8x32xf32>
    %c0_82 = arith.constant 0 : index
    %c64 = arith.constant 64 : index
    %353 = vector.load %arg18[%c0_82, %c64] : memref<8x256xf32, #tpu.memory_space<vmem>>, vector<8x32xf32>
    tpu.vector_store %arg18[%c0_82, %c64], %352 {strides = array<i32>} : memref<8x256xf32, #tpu.memory_space<vmem>>, vector<8x32xf32>,
    %354 = vector.extract_strided_slice %257 {offsets = [24, 0], sizes = [8, 96], strides = [1, 1]} : vector<64x96xf32> to vector<8x96xf32>
    %cst_83 = arith.constant dense<0.000000e+00> : vector<8x96xf32>
    %355 = tpu.matmul %352, %258, %cst_83 {dimension_numbers = #tpu.dot_dimension_numbers<[1], [0], [0], [1], [0, 0, 1, 1], [], []>} : vector<8x32xf32>, vector<32x96xf32>, vector<8x96xf32> -> vector<8x96xf32>
    %356 = vector.extract_strided_slice %354 {offsets = [0, 0], sizes = [8, 32], strides = [1, 1]} : vector<8x96xf32> to vector<8x32xf32>
    %357 = vector.extract_strided_slice %355 {offsets = [0, 0], sizes = [8, 32], strides = [1, 1]} : vector<8x96xf32> to vector<8x32xf32>
    %358 = arith.addf %356, %357 : vector<8x32xf32>
    %359 = arith.negf %358 : vector<8x32xf32>
    %360 = math.exp %359 : vector<8x32xf32>
    %cst_84 = arith.constant 1.000000e+00 : f32
    %361 = vector.broadcast %cst_84 : f32 to vector<8x32xf32>
    %362 = arith.addf %361, %360 : vector<8x32xf32>
    %363 = arith.divf %361, %362 : vector<8x32xf32>
    %364 = vector.extract_strided_slice %354 {offsets = [0, 32], sizes = [8, 32], strides = [1, 1]} : vector<8x96xf32> to vector<8x32xf32>
    %365 = vector.extract_strided_slice %355 {offsets = [0, 32], sizes = [8, 32], strides = [1, 1]} : vector<8x96xf32> to vector<8x32xf32>
    %366 = arith.addf %364, %365 : vector<8x32xf32>
    %367 = arith.negf %366 : vector<8x32xf32>
    %368 = math.exp %367 : vector<8x32xf32>
    %cst_85 = arith.constant 1.000000e+00 : f32
    %369 = vector.broadcast %cst_85 : f32 to vector<8x32xf32>
    %370 = arith.addf %369, %368 : vector<8x32xf32>
    %371 = arith.divf %369, %370 : vector<8x32xf32>
    %372 = vector.extract_strided_slice %354 {offsets = [0, 64], sizes = [8, 32], strides = [1, 1]} : vector<8x96xf32> to vector<8x32xf32>
    %373 = vector.extract_strided_slice %355 {offsets = [0, 64], sizes = [8, 32], strides = [1, 1]} : vector<8x96xf32> to vector<8x32xf32>
    %374 = arith.addf %373, %261 : vector<8x32xf32>
    %375 = arith.mulf %363, %374 : vector<8x32xf32>
    %376 = arith.addf %372, %375 : vector<8x32xf32>
    %377 = math.tanh %376 : vector<8x32xf32>
    %cst_86 = arith.constant 1.000000e+00 : f32
    %378 = vector.broadcast %cst_86 : f32 to vector<8x32xf32>
    %379 = arith.subf %378, %371 : vector<8x32xf32>
    %380 = arith.mulf %379, %377 : vector<8x32xf32>
    %381 = arith.mulf %371, %352 : vector<8x32xf32>
    %382 = arith.addf %380, %381 : vector<8x32xf32>
    %c0_87 = arith.constant 0 : index
    %c96 = arith.constant 96 : index
    %383 = vector.load %arg18[%c0_87, %c96] : memref<8x256xf32, #tpu.memory_space<vmem>>, vector<8x32xf32>
    tpu.vector_store %arg18[%c0_87, %c96], %382 {strides = array<i32>} : memref<8x256xf32, #tpu.memory_space<vmem>>, vector<8x32xf32>,
    %384 = vector.extract_strided_slice %257 {offsets = [32, 0], sizes = [8, 96], strides = [1, 1]} : vector<64x96xf32> to vector<8x96xf32>
    %cst_88 = arith.constant dense<0.000000e+00> : vector<8x96xf32>
    %385 = tpu.matmul %382, %258, %cst_88 {dimension_numbers = #tpu.dot_dimension_numbers<[1], [0], [0], [1], [0, 0, 1, 1], [], []>} : vector<8x32xf32>, vector<32x96xf32>, vector<8x96xf32> -> vector<8x96xf32>
    %386 = vector.extract_strided_slice %384 {offsets = [0, 0], sizes = [8, 32], strides = [1, 1]} : vector<8x96xf32> to vector<8x32xf32>
    %387 = vector.extract_strided_slice %385 {offsets = [0, 0], sizes = [8, 32], strides = [1, 1]} : vector<8x96xf32> to vector<8x32xf32>
    %388 = arith.addf %386, %387 : vector<8x32xf32>
    %389 = arith.negf %388 : vector<8x32xf32>
    %390 = math.exp %389 : vector<8x32xf32>
    %cst_89 = arith.constant 1.000000e+00 : f32
    %391 = vector.broadcast %cst_89 : f32 to vector<8x32xf32>
    %392 = arith.addf %391, %390 : vector<8x32xf32>
    %393 = arith.divf %391, %392 : vector<8x32xf32>
    %394 = vector.extract_strided_slice %384 {offsets = [0, 32], sizes = [8, 32], strides = [1, 1]} : vector<8x96xf32> to vector<8x32xf32>
    %395 = vector.extract_strided_slice %385 {offsets = [0, 32], sizes = [8, 32], strides = [1, 1]} : vector<8x96xf32> to vector<8x32xf32>
    %396 = arith.addf %394, %395 : vector<8x32xf32>
    %397 = arith.negf %396 : vector<8x32xf32>
    %398 = math.exp %397 : vector<8x32xf32>
    %cst_90 = arith.constant 1.000000e+00 : f32
    %399 = vector.broadcast %cst_90 : f32 to vector<8x32xf32>
    %400 = arith.addf %399, %398 : vector<8x32xf32>
    %401 = arith.divf %399, %400 : vector<8x32xf32>
    %402 = vector.extract_strided_slice %384 {offsets = [0, 64], sizes = [8, 32], strides = [1, 1]} : vector<8x96xf32> to vector<8x32xf32>
    %403 = vector.extract_strided_slice %385 {offsets = [0, 64], sizes = [8, 32], strides = [1, 1]} : vector<8x96xf32> to vector<8x32xf32>
    %404 = arith.addf %403, %261 : vector<8x32xf32>
    %405 = arith.mulf %393, %404 : vector<8x32xf32>
    %406 = arith.addf %402, %405 : vector<8x32xf32>
    %407 = math.tanh %406 : vector<8x32xf32>
    %cst_91 = arith.constant 1.000000e+00 : f32
    %408 = vector.broadcast %cst_91 : f32 to vector<8x32xf32>
    %409 = arith.subf %408, %401 : vector<8x32xf32>
    %410 = arith.mulf %409, %407 : vector<8x32xf32>
    %411 = arith.mulf %401, %382 : vector<8x32xf32>
    %412 = arith.addf %410, %411 : vector<8x32xf32>
    %c0_92 = arith.constant 0 : index
    %c128 = arith.constant 128 : index
    %413 = vector.load %arg18[%c0_92, %c128] : memref<8x256xf32, #tpu.memory_space<vmem>>, vector<8x32xf32>
    tpu.vector_store %arg18[%c0_92, %c128], %412 {strides = array<i32>} : memref<8x256xf32, #tpu.memory_space<vmem>>, vector<8x32xf32>,
    %414 = vector.extract_strided_slice %257 {offsets = [40, 0], sizes = [8, 96], strides = [1, 1]} : vector<64x96xf32> to vector<8x96xf32>
    %cst_93 = arith.constant dense<0.000000e+00> : vector<8x96xf32>
    %415 = tpu.matmul %412, %258, %cst_93 {dimension_numbers = #tpu.dot_dimension_numbers<[1], [0], [0], [1], [0, 0, 1, 1], [], []>} : vector<8x32xf32>, vector<32x96xf32>, vector<8x96xf32> -> vector<8x96xf32>
    %416 = vector.extract_strided_slice %414 {offsets = [0, 0], sizes = [8, 32], strides = [1, 1]} : vector<8x96xf32> to vector<8x32xf32>
    %417 = vector.extract_strided_slice %415 {offsets = [0, 0], sizes = [8, 32], strides = [1, 1]} : vector<8x96xf32> to vector<8x32xf32>
    %418 = arith.addf %416, %417 : vector<8x32xf32>
    %419 = arith.negf %418 : vector<8x32xf32>
    %420 = math.exp %419 : vector<8x32xf32>
    %cst_94 = arith.constant 1.000000e+00 : f32
    %421 = vector.broadcast %cst_94 : f32 to vector<8x32xf32>
    %422 = arith.addf %421, %420 : vector<8x32xf32>
    %423 = arith.divf %421, %422 : vector<8x32xf32>
    %424 = vector.extract_strided_slice %414 {offsets = [0, 32], sizes = [8, 32], strides = [1, 1]} : vector<8x96xf32> to vector<8x32xf32>
    %425 = vector.extract_strided_slice %415 {offsets = [0, 32], sizes = [8, 32], strides = [1, 1]} : vector<8x96xf32> to vector<8x32xf32>
    %426 = arith.addf %424, %425 : vector<8x32xf32>
    %427 = arith.negf %426 : vector<8x32xf32>
    %428 = math.exp %427 : vector<8x32xf32>
    %cst_95 = arith.constant 1.000000e+00 : f32
    %429 = vector.broadcast %cst_95 : f32 to vector<8x32xf32>
    %430 = arith.addf %429, %428 : vector<8x32xf32>
    %431 = arith.divf %429, %430 : vector<8x32xf32>
    %432 = vector.extract_strided_slice %414 {offsets = [0, 64], sizes = [8, 32], strides = [1, 1]} : vector<8x96xf32> to vector<8x32xf32>
    %433 = vector.extract_strided_slice %415 {offsets = [0, 64], sizes = [8, 32], strides = [1, 1]} : vector<8x96xf32> to vector<8x32xf32>
    %434 = arith.addf %433, %261 : vector<8x32xf32>
    %435 = arith.mulf %423, %434 : vector<8x32xf32>
    %436 = arith.addf %432, %435 : vector<8x32xf32>
    %437 = math.tanh %436 : vector<8x32xf32>
    %cst_96 = arith.constant 1.000000e+00 : f32
    %438 = vector.broadcast %cst_96 : f32 to vector<8x32xf32>
    %439 = arith.subf %438, %431 : vector<8x32xf32>
    %440 = arith.mulf %439, %437 : vector<8x32xf32>
    %441 = arith.mulf %431, %412 : vector<8x32xf32>
    %442 = arith.addf %440, %441 : vector<8x32xf32>
    %c0_97 = arith.constant 0 : index
    %c160 = arith.constant 160 : index
    %443 = vector.load %arg18[%c0_97, %c160] : memref<8x256xf32, #tpu.memory_space<vmem>>, vector<8x32xf32>
    tpu.vector_store %arg18[%c0_97, %c160], %442 {strides = array<i32>} : memref<8x256xf32, #tpu.memory_space<vmem>>, vector<8x32xf32>,
    %444 = vector.extract_strided_slice %257 {offsets = [48, 0], sizes = [8, 96], strides = [1, 1]} : vector<64x96xf32> to vector<8x96xf32>
    %cst_98 = arith.constant dense<0.000000e+00> : vector<8x96xf32>
    %445 = tpu.matmul %442, %258, %cst_98 {dimension_numbers = #tpu.dot_dimension_numbers<[1], [0], [0], [1], [0, 0, 1, 1], [], []>} : vector<8x32xf32>, vector<32x96xf32>, vector<8x96xf32> -> vector<8x96xf32>
    %446 = vector.extract_strided_slice %444 {offsets = [0, 0], sizes = [8, 32], strides = [1, 1]} : vector<8x96xf32> to vector<8x32xf32>
    %447 = vector.extract_strided_slice %445 {offsets = [0, 0], sizes = [8, 32], strides = [1, 1]} : vector<8x96xf32> to vector<8x32xf32>
    %448 = arith.addf %446, %447 : vector<8x32xf32>
    %449 = arith.negf %448 : vector<8x32xf32>
    %450 = math.exp %449 : vector<8x32xf32>
    %cst_99 = arith.constant 1.000000e+00 : f32
    %451 = vector.broadcast %cst_99 : f32 to vector<8x32xf32>
    %452 = arith.addf %451, %450 : vector<8x32xf32>
    %453 = arith.divf %451, %452 : vector<8x32xf32>
    %454 = vector.extract_strided_slice %444 {offsets = [0, 32], sizes = [8, 32], strides = [1, 1]} : vector<8x96xf32> to vector<8x32xf32>
    %455 = vector.extract_strided_slice %445 {offsets = [0, 32], sizes = [8, 32], strides = [1, 1]} : vector<8x96xf32> to vector<8x32xf32>
    %456 = arith.addf %454, %455 : vector<8x32xf32>
    %457 = arith.negf %456 : vector<8x32xf32>
    %458 = math.exp %457 : vector<8x32xf32>
    %cst_100 = arith.constant 1.000000e+00 : f32
    %459 = vector.broadcast %cst_100 : f32 to vector<8x32xf32>
    %460 = arith.addf %459, %458 : vector<8x32xf32>
    %461 = arith.divf %459, %460 : vector<8x32xf32>
    %462 = vector.extract_strided_slice %444 {offsets = [0, 64], sizes = [8, 32], strides = [1, 1]} : vector<8x96xf32> to vector<8x32xf32>
    %463 = vector.extract_strided_slice %445 {offsets = [0, 64], sizes = [8, 32], strides = [1, 1]} : vector<8x96xf32> to vector<8x32xf32>
    %464 = arith.addf %463, %261 : vector<8x32xf32>
    %465 = arith.mulf %453, %464 : vector<8x32xf32>
    %466 = arith.addf %462, %465 : vector<8x32xf32>
    %467 = math.tanh %466 : vector<8x32xf32>
    %cst_101 = arith.constant 1.000000e+00 : f32
    %468 = vector.broadcast %cst_101 : f32 to vector<8x32xf32>
    %469 = arith.subf %468, %461 : vector<8x32xf32>
    %470 = arith.mulf %469, %467 : vector<8x32xf32>
    %471 = arith.mulf %461, %442 : vector<8x32xf32>
    %472 = arith.addf %470, %471 : vector<8x32xf32>
    %c0_102 = arith.constant 0 : index
    %c192 = arith.constant 192 : index
    %473 = vector.load %arg18[%c0_102, %c192] : memref<8x256xf32, #tpu.memory_space<vmem>>, vector<8x32xf32>
    tpu.vector_store %arg18[%c0_102, %c192], %472 {strides = array<i32>} : memref<8x256xf32, #tpu.memory_space<vmem>>, vector<8x32xf32>,
    %474 = vector.extract_strided_slice %257 {offsets = [56, 0], sizes = [8, 96], strides = [1, 1]} : vector<64x96xf32> to vector<8x96xf32>
    %cst_103 = arith.constant dense<0.000000e+00> : vector<8x96xf32>
    %475 = tpu.matmul %472, %258, %cst_103 {dimension_numbers = #tpu.dot_dimension_numbers<[1], [0], [0], [1], [0, 0, 1, 1], [], []>} : vector<8x32xf32>, vector<32x96xf32>, vector<8x96xf32> -> vector<8x96xf32>
    %476 = vector.extract_strided_slice %474 {offsets = [0, 0], sizes = [8, 32], strides = [1, 1]} : vector<8x96xf32> to vector<8x32xf32>
    %477 = vector.extract_strided_slice %475 {offsets = [0, 0], sizes = [8, 32], strides = [1, 1]} : vector<8x96xf32> to vector<8x32xf32>
    %478 = arith.addf %476, %477 : vector<8x32xf32>
    %479 = arith.negf %478 : vector<8x32xf32>
    %480 = math.exp %479 : vector<8x32xf32>
    %cst_104 = arith.constant 1.000000e+00 : f32
    %481 = vector.broadcast %cst_104 : f32 to vector<8x32xf32>
    %482 = arith.addf %481, %480 : vector<8x32xf32>
    %483 = arith.divf %481, %482 : vector<8x32xf32>
    %484 = vector.extract_strided_slice %474 {offsets = [0, 32], sizes = [8, 32], strides = [1, 1]} : vector<8x96xf32> to vector<8x32xf32>
    %485 = vector.extract_strided_slice %475 {offsets = [0, 32], sizes = [8, 32], strides = [1, 1]} : vector<8x96xf32> to vector<8x32xf32>
    %486 = arith.addf %484, %485 : vector<8x32xf32>
    %487 = arith.negf %486 : vector<8x32xf32>
    %488 = math.exp %487 : vector<8x32xf32>
    %cst_105 = arith.constant 1.000000e+00 : f32
    %489 = vector.broadcast %cst_105 : f32 to vector<8x32xf32>
    %490 = arith.addf %489, %488 : vector<8x32xf32>
    %491 = arith.divf %489, %490 : vector<8x32xf32>
    %492 = vector.extract_strided_slice %474 {offsets = [0, 64], sizes = [8, 32], strides = [1, 1]} : vector<8x96xf32> to vector<8x32xf32>
    %493 = vector.extract_strided_slice %475 {offsets = [0, 64], sizes = [8, 32], strides = [1, 1]} : vector<8x96xf32> to vector<8x32xf32>
    %494 = arith.addf %493, %261 : vector<8x32xf32>
    %495 = arith.mulf %483, %494 : vector<8x32xf32>
    %496 = arith.addf %492, %495 : vector<8x32xf32>
    %497 = math.tanh %496 : vector<8x32xf32>
    %cst_106 = arith.constant 1.000000e+00 : f32
    %498 = vector.broadcast %cst_106 : f32 to vector<8x32xf32>
    %499 = arith.subf %498, %491 : vector<8x32xf32>
    %500 = arith.mulf %499, %497 : vector<8x32xf32>
    %501 = arith.mulf %491, %472 : vector<8x32xf32>
    %502 = arith.addf %500, %501 : vector<8x32xf32>
    %c0_107 = arith.constant 0 : index
    %c224 = arith.constant 224 : index
    %503 = vector.load %arg18[%c0_107, %c224] : memref<8x256xf32, #tpu.memory_space<vmem>>, vector<8x32xf32>
    tpu.vector_store %arg18[%c0_107, %c224], %502 {strides = array<i32>} : memref<8x256xf32, #tpu.memory_space<vmem>>, vector<8x32xf32>,
    %c0_108 = arith.constant 0 : index
    %c0_109 = arith.constant 0 : index
    %504 = vector.load %arg18[%c0_108, %c0_109] : memref<8x256xf32, #tpu.memory_space<vmem>>, vector<8x256xf32>
    %c0_110 = arith.constant 0 : index
    %c0_111 = arith.constant 0 : index
    %505 = vector.load %arg10[%c0_110, %c0_111] : memref<256x256xf32, #tpu.memory_space<vmem>>, vector<256x256xf32>
    %cst_112 = arith.constant dense<0.000000e+00> : vector<8x256xf32>
    %506 = tpu.matmul %504, %505, %cst_112 {dimension_numbers = #tpu.dot_dimension_numbers<[1], [0], [0], [1], [0, 0, 1, 1], [], []>} : vector<8x256xf32>, vector<256x256xf32>, vector<8x256xf32> -> vector<8x256xf32>
    %c0_113 = arith.constant 0 : index
    %c0_114 = arith.constant 0 : index
    %507 = vector.load %arg11[%c0_113, %c0_114] : memref<1x256xf32, #tpu.memory_space<vmem>>, vector<1x256xf32>
    %508 = vector.broadcast %507 : vector<1x256xf32> to vector<8x256xf32>
    %509 = arith.addf %506, %508 : vector<8x256xf32>
    %cst_115 = arith.constant 0.000000e+00 : f32
    %510 = vector.broadcast %cst_115 : f32 to vector<8x256xf32>
    %511 = arith.maximumf %509, %510 : vector<8x256xf32>
    %c0_116 = arith.constant 0 : index
    %c0_117 = arith.constant 0 : index
    %512 = vector.load %arg12[%c0_116, %c0_117] : memref<256x64xf32, #tpu.memory_space<vmem>>, vector<256x64xf32>
    %cst_118 = arith.constant dense<0.000000e+00> : vector<8x64xf32>
    %513 = tpu.matmul %511, %512, %cst_118 {dimension_numbers = #tpu.dot_dimension_numbers<[1], [0], [0], [1], [0, 0, 1, 1], [], []>} : vector<8x256xf32>, vector<256x64xf32>, vector<8x64xf32> -> vector<8x64xf32>
    %c0_119 = arith.constant 0 : index
    %c0_120 = arith.constant 0 : index
    %514 = vector.load %arg13[%c0_119, %c0_120] : memref<1x64xf32, #tpu.memory_space<vmem>>, vector<1x64xf32>
    %515 = vector.broadcast %514 : vector<1x64xf32> to vector<8x64xf32>
    %516 = arith.addf %513, %515 : vector<8x64xf32>
    %cst_121 = arith.constant 0.000000e+00 : f32
    %517 = vector.broadcast %cst_121 : f32 to vector<8x64xf32>
    %518 = arith.maximumf %516, %517 : vector<8x64xf32>
    %c0_122 = arith.constant 0 : index
    %c0_123 = arith.constant 0 : index
    %519 = vector.load %arg14[%c0_122, %c0_123] : memref<64x3xf32, #tpu.memory_space<vmem>>, vector<64x3xf32>
    %cst_124 = arith.constant dense<0.000000e+00> : vector<8x3xf32>
    %520 = tpu.matmul %518, %519, %cst_124 {dimension_numbers = #tpu.dot_dimension_numbers<[1], [0], [0], [1], [0, 0, 1, 1], [], []>} : vector<8x64xf32>, vector<64x3xf32>, vector<8x3xf32> -> vector<8x3xf32>
    %c0_125 = arith.constant 0 : index
    %c0_126 = arith.constant 0 : index
    %521 = vector.load %arg15[%c0_125, %c0_126] : memref<1x3xf32, #tpu.memory_space<vmem>>, vector<1x3xf32>
    %522 = vector.broadcast %521 : vector<1x3xf32> to vector<8x3xf32>
    %523 = arith.addf %520, %522 : vector<8x3xf32>
    %524 = vector.extract_strided_slice %523 {offsets = [0, 0], sizes = [2, 3], strides = [1, 1]} : vector<8x3xf32> to vector<2x3xf32>
    %c0_127 = arith.constant 0 : index
    %c0_128 = arith.constant 0 : index
    %525 = vector.load %arg16[%c0_127, %c0_128] : memref<2x3xf32, #tpu.memory_space<vmem>>, vector<2x3xf32>
    tpu.vector_store %arg16[%c0_127, %c0_128], %524 {strides = array<i32>} : memref<2x3xf32, #tpu.memory_space<vmem>>, vector<2x3xf32>,
    return
  }
}

</mosaic_0001>

<bundles_post_ra>
// kernel: a_call__.1
= control target key start
LH: loop header
LB: loop body
LE: loop exit
PB: predicated region body
PF: predicated region fallthrough
CT: control target
= control target key end

     0   :  { %s3784_s0 = inlined_call_operand.vmem [shape: f32[64,4], index: 0, kind: input, shape index: {}]   ;;  %s3785_s1 = inlined_call_operand.vmem [shape: f32[2,8,32], index: 1, kind: input, shape index: {}]   ;;  %s3786_s2 = inlined_call_operand.vmem [shape: f32[4,96], index: 2, kind: input, shape index: {}]   ;;  %s3787_s3 = inlined_call_operand.vmem [shape: f32[32,96], index: 3, kind: input, shape index: {}]   ;;  %s3788_s4 = inlined_call_operand.vmem [shape: f32[1,96], index: 4, kind: input, shape index: {}]   ;;  %s3789_s5 = inlined_call_operand.vmem [shape: f32[1,32], index: 5, kind: input, shape index: {}]   ;;  %s3790_s6 = inlined_call_operand.vmem [shape: f32[32,96], index: 6, kind: input, shape index: {}]   ;;  %s3791_s7 = inlined_call_operand.hbm [shape: f32[32,96], index: 7, kind: input, shape index: {}]   ;;  %s3792_s8 = inlined_call_operand.vmem [shape: f32[1,96], index: 8, kind: input, shape index: {}]   ;;  %s3793_s9 = inlined_call_operand.vmem [shape: f32[1,32], index: 9, kind: input, shape index: {}]   ;;  %s3794_s10 = inlined_call_operand.hbm [shape: f32[256,256], index: 10, kind: input, shape index: {}]   ;;  %s3795_s11 = inlined_call_operand.vmem [shape: f32[1,256], index: 11, kind: input, shape index: {}]   ;;  %s3796_s12 = inlined_call_operand.hbm [shape: f32[256,64], index: 12, kind: input, shape index: {}]   ;;  %s3797_s13 = inlined_call_operand.hbm [shape: f32[1,64], index: 13, kind: input, shape index: {}]   ;;  %s3798_s14 = inlined_call_operand.vmem [shape: f32[64,3], index: 14, kind: input, shape index: {}]   ;;  %s3799_s15 = inlined_call_operand.hbm [shape: f32[1,3], index: 15, kind: input, shape index: {}]   ;;  %s3800_s16 = inlined_call_operand.hbm [shape: f32[2,3], index: 16, kind: output, shape index: {}]  }
   0x1   :  { %3802 = sst [smem:[#allocation18_spill]] %s3784_s0 }
   0x2   :  { %21 = vsyncpa [#allocation5], 0 }
   0x3   :  { %22 = vsyncpa [#allocation8], 0 }
   0x4   :  { %23 = vsyncpa [#allocation11], 0 }
   0x5   :  { %24 = vsyncpa [#allocation6], 0  ;;  %s3166_s21 = smov [#allocation7]  }
   0x6   :  { %s60_s22 = sshll.u32 %s3166_s21, 4  ;;  %s61_s22 = int_to_ptr.vmem [resolvable:$true] %s60_s22 }
   0x7   :  { %s3046_s23 = scalar_lea.vmem %s61_s22, 8192  ;;  %p3051_p1 = scmp.lt.s32.totalorder %s61_s22, %s61_s22 }
   0x8   :  { %p3047_p0 = scmp.ne.s32.totalorder %s61_s22, %s3046_s23  ;;  %p3052_p2 = scmp.lt.s32.totalorder %s3046_s23, %s3046_s23 }
   0xa   :  { %p3053_p3 = por %p3052_p2, %p3051_p1 }
   0xc   :  { %p3054_p4 = pnand %p3053_p3, %p3047_p0 }
   0xe   :  { %3057 = shalt.err (!%p3054_p4)
}
   0xf   :  { %s3167_s24 = smov 256   ;;  %s3168_s25 = smov 16  }
  0x10   :  { %66 = dma.hbm_to_vmem [thread:$0]  %s3794_s10, 8192, %s61_s22, [#allocation8], %s3167_s24, %s3167_s24, %s3168_s25  }
  0x11   :  { %s3169_s28 = smov [#allocation10]   ;;  %s3170_s30 = smov [#allocation4]  }
  0x12   :  { %s87_s29 = sshll.u32 %s3169_s28, 4  ;;  %s44_s0 = sshll.u32 %s3170_s30, 4  ;;  %s88_s29 = int_to_ptr.vmem [resolvable:$true] %s87_s29  ;;  %s45_s0 = int_to_ptr.vmem [resolvable:$true] %s44_s0 }
  0x13   :  { %s3066_s17 = scalar_lea.vmem %s88_s29, 16  ;;  %s3070_s18 = scalar_lea.vmem %s88_s29, 32 }
  0x14   :  { %p3067_p5 = scmp.ne.s32.totalorder %s88_s29, %s3066_s17  ;;  %p3071_p6 = scmp.lt.s32.totalorder %s88_s29, %s88_s29 }
  0x15   :  { %p3072_p7 = scmp.lt.s32.totalorder %s3070_s18, %s3066_s17 }
  0x17   :  { %p3073_p8 = por %p3072_p7, %p3071_p6 }
  0x19   :  { %p3074_p9 = pnand %p3073_p8, %p3067_p5 }
  0x1b   :  { %3077 = shalt.err (!%p3074_p9)
}
  0x1c   :  { %90 = dma.hbm_to_vmem [thread:$0]  %s3797_s13, 16, %s88_s29, [#allocation11]  }
  0x1d   :  { %s3086_s21 = scalar_lea.vmem %s45_s0, 512  ;;  %p3091_p11 = scmp.lt.s32.totalorder %s45_s0, %s45_s0 }
  0x1e   :  { %p3087_p10 = scmp.ne.s32.totalorder %s45_s0, %s3086_s21  ;;  %p3092_p12 = scmp.lt.s32.totalorder %s3086_s21, %s3086_s21 }
  0x20   :  { %p3093_p13 = por %p3092_p12, %p3091_p11 }
  0x22   :  { %p3094_p0 = pnand %p3093_p13, %p3087_p10 }
  0x24   :  { %3097 = shalt.err (!%p3094_p0)
}
  0x25   :  { %s3171_s10 = smov 128   ;;  %s3172_s22 = smov 8  }
  0x26   :  { %50 = dma.hbm_to_vmem [thread:$0]  %s3791_s7, 512, %s45_s0, [#allocation5], %s3171_s10, %s3171_s10, %s3172_s22  }
  0x27   :  { %s3173_s25 = smov [#allocation9]   ;;  %s3174_s27 = smov [#allocation12]  }
  0x28   :  { %s74_s26 = sshll.u32 %s3173_s25, 4  ;;  %s99_s28 = sshll.u32 %s3174_s27, 4  ;;  %s75_s26 = int_to_ptr.vmem [resolvable:$true] %s74_s26  ;;  %s100_s28 = int_to_ptr.vmem [resolvable:$true] %s99_s28 }
  0x29   :  { %s3106_s13 = scalar_lea.vmem %s75_s26, 4096  ;;  %p3111_p2 = scmp.lt.s32.totalorder %s75_s26, %s75_s26 }
  0x2a   :  { %p3107_p1 = scmp.ne.s32.totalorder %s75_s26, %s3106_s13  ;;  %p3112_p3 = scmp.lt.s32.totalorder %s3106_s13, %s3106_s13 }
  0x2c   :  { %p3113_p4 = por %p3112_p3, %p3111_p2 }
  0x2e   :  { %p3114_p5 = pnand %p3113_p4, %p3107_p1 }
  0x30   :  { %3117 = shalt.err (!%p3114_p5)
}
  0x31   :  { %80 = dma.hbm_to_vmem [thread:$0]  %s3796_s12, 4096, %s75_s26, [#allocation8], %s3171_s10, %s3171_s10, %s3172_s22  }
  0x32   :  { %s3126_s17 = scalar_lea.vmem %s100_s28, 16  ;;  %s3130_s7 = scalar_lea.vmem %s100_s28, 32 }
  0x33   :  { %p3127_p6 = scmp.ne.s32.totalorder %s100_s28, %s3126_s17  ;;  %p3131_p7 = scmp.lt.s32.totalorder %s100_s28, %s100_s28 }
  0x34   :  { %p3132_p8 = scmp.lt.s32.totalorder %s3130_s7, %s3126_s17 }
  0x36   :  { %p3133_p9 = por %p3132_p8, %p3131_p7 }
  0x38   :  { %p3134_p10 = pnand %p3133_p9, %p3127_p6 }
  0x3a   :  { %3137 = shalt.err (!%p3134_p10)
}
  0x3b   :  { %102 = dma.hbm_to_vmem [thread:$0]  %s3799_s15, 16, %s100_s28, [#allocation11]  }
  0x3c   :  { %3158 = dma.done.wait [#allocation5], 512  }
  0x3d   :  { %3159 = vsyncadd [#allocation5], 4294966784 }
  0x3e   :  { %3160 = dma.done.wait [#allocation8], 12288  }
  0x3f   :  { %3161 = vsyncadd [#allocation8], 4294955008 }
  0x40   :  { %3162 = dma.done.wait [#allocation11], 32  }
  0x41   :  { %3163 = vsyncadd [#allocation11], 4294967264  ;;  %vm159_vm0 = vcmask 1043456   ;;  %vm134_vm1 = vcmask 31744   ;;  %v126_v0 = vld [vmem:[%s3786_s2] sm:$0xf] }
  0x42   :  { %s3803_s10 = sld [smem:[#allocation18_spill]]  ;;  %2925 = vmatprep.subr.msk.mxu1 %vm159_vm0, %v126_v0  ;;  %v3295_v3 = vld [vmem:[%s3787_s3 + $0x18] sm:$0xff]  ;;  %2696 = vmatprep.subr.msk.mxu0 %vm159_vm0, %v126_v0  ;;  %v3175_v5 = vmov 0.0   ;;  %v3307_v6 = vld [vmem:[%s3787_s3 + $0x10] sm:$0xff]  ;;  %v3325_v10 = vld [vmem:[%s3787_s3 + $0x8] sm:$0xff]  ;;  %vm279_vm2 = vcmask 261120  }
  0x43   :  { %2926 = vmatpush3.msk.msra.mxu1 %vm159_vm0, %v126_v0  ;;  %2697 = vmatpush3.msk.msra.mxu0 %vm159_vm0, %v126_v0  ;;  %v3334_v11 = vld [vmem:[%s3787_s3] sm:$0xff]  ;;  %vm3176_vm3 = vmmov 0   ;;  %s3177_s3 = smov 64   ;;  %s3179_s25 = smov 96   ;;  %vm1489_vm4 = vcmask 523520   ;;  %vm1597_vm5 = vcmask 785920  }
  0x44   :  { %2710 = vmatprep.subr.mxu1 %v3175_v5  ;;  %v2504_v12 = vld [vmem:[%s3789_s5] ss:$0 sm:$0xff]  ;;  %2732 = vmatprep.subr.mxu0 %v3175_v5  ;;  %s3178_s5 = smov 32   ;;  %vm1704_vm6 = vcmask 1048320   ;;  %vm2401_vm7 = vcmask 523264   ;;  %s3180_s29 = smov [#allocation13]  }
  0x45   :  { %v278_v13 = vld [vmem:[%s3785_s1] sm:$0xff]  ;;  %360 = vrot.lane.b32.xlu0 %v2504_v12, %s3177_s3  ;;  %s2483_s30 = sshll.u32 %s3180_s29, 4  ;;  %vm2475_vm8 = vcmask 17408   ;;  %s2484_s30 = int_to_ptr.vmem [resolvable:$true] %s2483_s30 }
  0x46   :  { %v3386_v24 = vld [vmem:[%s3788_s4] ss:$0 sm:$0xff]  ;;  %s3138_s17 = scalar_lea.vmem %s2484_s30, 32  ;;  %p3143_p12 = scmp.lt.s32.totalorder %s2484_s30, %s2484_s30 }
  0x47   :  { %p3139_p11 = scmp.ne.s32.totalorder %s2484_s30, %s3138_s17  ;;  %p3144_p13 = scmp.lt.s32.totalorder %s3138_s17, %s3138_s17 }
  0x48   :  { %v122_v1 = vld [vmem:[%s3803_s10 + $0x20] sm:$0xff]  ;;  %v123_v2 = vld [vmem:[%s3803_s10 + $0x28] sm:$0xff]  ;;  %v124_v4 = vld [vmem:[%s3803_s10 + $0x30] sm:$0xff] }
  0x49   :  { %2704 = vmatprep.mubr.msk.f32.mxu1 %vm134_vm1, %v122_v1  ;;  %v118_v7 = vld [vmem:[%s3803_s10] sm:$0xff]  ;;  %v125_v8 = vld [vmem:[%s3803_s10 + $0x38] sm:$0xff]  ;;  %v119_v9 = vld [vmem:[%s3803_s10 + $0x8] sm:$0xff]  ;;  %p3145_p0 = por %p3144_p13, %p3143_p12 }
  0x4a   :  { %2705 = vmatmul.mubr.msk.f32.vlgmr.msra.gmra.mxu1 %vm134_vm1, %v123_v2  ;;  %2698 = vmatprep.mubr.msk.f32.mxu0 %vm134_vm1, %v118_v7  ;;  %v120_v56 = vld [vmem:[%s3803_s10 + $0x10] sm:$0xff]  ;;  %v121_v57 = vld [vmem:[%s3803_s10 + $0x18] sm:$0xff] }
  0x4b   :  { %2711 = vmatpush3.msra.mxu1 %v3295_v3  ;;  %2707 = vmatprep.mubr.msk.f32.mxu1 %vm134_vm1, %v124_v4  ;;  %p3146_p1 = pnand %p3145_p0, %p3139_p11 }
  0x4c   :  { %2712 = vmatprep.subr.mxu1 %v3175_v5  ;;  %2699 = vmatmul.mubr.msk.f32.vlgmr.msra.gmra.mxu0 %vm134_vm1, %v119_v9 }
  0x4d   :  { %2713 = vmatpush3.msra.mxu1 %v3307_v6  ;;  %2733 = vmatpush3.msra.mxu0 %v3295_v3 }
  0x4e   :  { %2708 = vmatmul.mubr.msk.f32.gmra.mxu1 %vm134_vm1, %v125_v8  ;;  %2714 = vmatprep.subr.mxu1 %v3175_v5 }
  0x4f   :  { %2715 = vmatpush3.msra.mxu1 %v3325_v10  ;;  %2718 = vmatprep.mubr.msk.f32.mxu1 %vm3176_vm3, %v3175_v5 }
  0x50   :  { %2716 = vmatprep.subr.mxu1 %v3175_v5  ;;  %2734 = vmatprep.subr.mxu0 %v3175_v5 }
  0x51   :  { %2717 = vmatpush3.msra.mxu1 %v3334_v11  ;;  %2735 = vmatpush3.msra.mxu0 %v3307_v6 }
  0x52   :  { %2719 = vmatmul.mubr.msk.f32.vlgmr.msra.gmra.mxu1 %vm279_vm2, %v278_v13  ;;  %2721 = vmatprep.subr.mxu1 %v3175_v5 }
  0x53   :  { %2722 = vmatpush3.msra.mxu1 %v3295_v3  ;;  %2729 = vmatprep.mubr.msk.f32.mxu1 %vm3176_vm3, %v3175_v5 }
  0x54   :  { %2723 = vmatprep.subr.mxu1 %v3175_v5  ;;  %2736 = vmatprep.subr.mxu0 %v3175_v5 }
  0x55   :  { %2724 = vmatpush3.msra.mxu1 %v3307_v6  ;;  %2737 = vmatpush3.msra.mxu0 %v3325_v10 }
  0x56   :  { %2725 = vmatprep.subr.mxu1 %v3175_v5  ;;  %2738 = vmatprep.subr.mxu0 %v3175_v5 }
  0x57   :  { %2726 = vmatpush3.msra.mxu1 %v3325_v10  ;;  %2739 = vmatpush3.msra.mxu0 %v3334_v11 }
  0x58   :  { %2727 = vmatprep.subr.mxu1 %v3175_v5  ;;  %2754 = vmatprep.subr.mxu0 %v3175_v5 }
  0x59   :  { %2728 = vmatpush3.msra.mxu1 %v3334_v11  ;;  %2701 = vmatprep.mubr.msk.f32.mxu0 %vm134_vm1, %v120_v56 }
  0x5a   :  { %2743 = vmatprep.subr.mxu1 %v3175_v5  ;;  %2702 = vmatmul.mubr.msk.f32.gmra.mxu0 %vm134_vm1, %v121_v57 }
  0x5b   :  { %2740 = vmatprep.mubr.msk.f32.mxu0 %vm3176_vm3, %v3175_v5 }
  0xb7   :  { %v3378_v18 = vpop.permute.xlu0 %360 }
 0x10a   :  { %v3370_v14 = vpop.f32.mrf.mxu1 }
 0x10c   :  { %v3372_v15 = vpop.f32.mrf.mxu1  ;;  %v2700_v22 = vpop.f32.mrf.mxu0 }
 0x10d   :  { %v235_v46 = vadd.f32 %v2700_v22, %v3386_v24  ;;  %v250_v57 = vadd.f32 %v3386_v24, %v3372_v15 }
 0x10e   :  { %v3374_v16 = vpop.f32.mrf.mxu1  ;;  %v229_v23 = vpop.f32.mrf.mxu0 }
 0x10f   :  { %v230_v25 = vadd.f32 %v3386_v24, %v229_v23 }
 0x110   :  { %v3376_v17 = vpop.f32.mrf.mxu1 }
 0x112   :  { %v349_v19 = vpop.f32.mrf.mxu1 }
 0x113   :  { %v363_v20 = vadd.f32 %v3378_v18, %v349_v19  ;;  %v353_v26 = vadd.f32 %v349_v19, %v230_v25 }
 0x114   :  { %v2720_v21 = vpop.f32.mrf.mxu1 }
 0x115   :  { %365 = vrot.lane.b32.xlu0 %v363_v20, %s3177_s3  ;;  %v2506_v27 = vmul.f32 -1.442695, %v353_v26 }
 0x117   :  { %2942 = vpow2.f32 %v2506_v27 }
 0x119   :  { %381 = vrot.lane.b32.xlu0 %v278_v13, %s3178_s5 }
 0x11a   :  { %v2703_v1 = vpop.f32.mrf.mxu0 }
 0x11c   :  { %v239_v2 = vpop.f32.mrf.mxu0 }
 0x11d   :  { %v240_v9 = vadd.f32 %v3386_v24, %v239_v2 }
 0x124   :  { %v2943_v28 = vpop.eup %2942 }
 0x125   :  { %v357_v29 = vadd.f32 1.0, %v2943_v28 }
 0x127   :  { %2944 = vrcp.f32 %v357_v29 }
 0x134   :  { %v2945_v30 = vpop.eup %2944 }
 0x135   :  { %v375_v37 = vsub.f32 1.0, %v2945_v30 }
 0x187   :  { %v366_v31 = vpop.permute.xlu0 %365 }
 0x188   :  { %v368_v32 = vmul.f32 %v2945_v30, %v366_v31 }
 0x18a   :  { %370 = vrot.lane.b32.xlu1 %v368_v32, %s3177_s3 }
 0x18b   :  { %v382_v36 = vpop.permute.xlu0 %381 }
 0x18c   :  { %v384_v39 = vmul.f32 %v2945_v30, %v382_v36 }
 0x1fc   :  { %v371_v33 = vpop.permute.xlu1 %370 }
 0x1fd   :  { %v373_v34 = vadd.f32 %v371_v33, %v230_v25 }
 0x1ff   :  { %2946 = vtanh.f32 %v373_v34 }
 0x20c   :  { %v2947_v35 = vpop.eup %2946 }
 0x20d   :  { %377 = vrot.lane.b32.xlu1 %v2947_v35, %s3179_s25 }
 0x27f   :  { %v378_v38 = vpop.permute.xlu1 %377 }
 0x280   :  { %v380_v40 = vmul.f32 %v378_v38, %v375_v37  ;;  %v245_v37 = vadd.f32 %v2703_v1, %v3386_v24 }
 0x282   :  { %v385_v41 = vadd.f32 %v384_v39, %v380_v40 }
 0x284   :  { %387 = vrot.lane.b32.xlu1 %v385_v41, %s3179_s25 }
 0x2f6   :  { %v388_v42 = vpop.permute.xlu1 %387 }
 0x2f7   :  { %390 = vst.msk [vmem:[#allocation2] sm:$0xff] %vm279_vm2, %v388_v42  ;;  %2730 = vmatmul.mubr.msk.f32.vlgmr.msra.gmra.mxu1 %vm279_vm2, %v388_v42 }
 0x2f8   :  { %2744 = vmatpush3.msra.mxu1 %v3295_v3  ;;  %2751 = vmatprep.mubr.msk.f32.mxu1 %vm3176_vm3, %v3175_v5 }
 0x2f9   :  { %2745 = vmatprep.subr.mxu1 %v3175_v5 }
 0x2fa   :  { %2746 = vmatpush3.msra.mxu1 %v3307_v6 }
 0x2fb   :  { %2747 = vmatprep.subr.mxu1 %v3175_v5 }
 0x2fc   :  { %2748 = vmatpush3.msra.mxu1 %v3325_v10 }
 0x2fd   :  { %2749 = vmatprep.subr.mxu1 %v3175_v5 }
 0x2fe   :  { %2750 = vmatpush3.msra.mxu1 %v3334_v11 }
 0x2ff   :  { %2765 = vmatprep.subr.mxu1 %v3175_v5 }
 0x3b7   :  { %v459_v43 = vpop.f32.mrf.mxu1 }
 0x3b8   :  { %v470_v44 = vadd.f32 %v459_v43, %v3378_v18  ;;  %v463_v47 = vadd.f32 %v459_v43, %v235_v46 }
 0x3b9   :  { %v2731_v45 = vpop.f32.mrf.mxu1 }
 0x3ba   :  { %472 = vrot.lane.b32.xlu0 %v470_v44, %s3177_s3  ;;  %v2508_v48 = vmul.f32 -1.442695, %v463_v47 }
 0x3bc   :  { %2948 = vpow2.f32 %v2508_v48 }
 0x3c9   :  { %v2949_v49 = vpop.eup %2948 }
 0x3ca   :  { %v467_v50 = vadd.f32 1.0, %v2949_v49 }
 0x3cc   :  { %2950 = vrcp.f32 %v467_v50 }
 0x3d9   :  { %v2951_v51 = vpop.eup %2950 }
 0x3da   :  { %v482_v59 = vsub.f32 1.0, %v2951_v51  ;;  %v488_v61 = vmul.f32 %v2951_v51, %v385_v41 }
 0x42c   :  { %v473_v52 = vpop.permute.xlu0 %472 }
 0x42d   :  { %v475_v53 = vmul.f32 %v2951_v51, %v473_v52 }
 0x42f   :  { %477 = vrot.lane.b32.xlu1 %v475_v53, %s3177_s3 }
 0x4a1   :  { %v478_v54 = vpop.permute.xlu1 %477 }
 0x4a2   :  { %v480_v55 = vadd.f32 %v478_v54, %v235_v46 }
 0x4a4   :  { %2952 = vtanh.f32 %v480_v55 }
 0x4b1   :  { %v2953_v58 = vpop.eup %2952 }
 0x4b2   :  { %484 = vrot.lane.b32.xlu0 %v2953_v58, %s3179_s25 }
 0x524   :  { %v485_v60 = vpop.permute.xlu0 %484 }
 0x525   :  { %v487_v62 = vmul.f32 %v485_v60, %v482_v59 }
 0x527   :  { %v489_v63 = vadd.f32 %v488_v61, %v487_v62 }
 0x529   :  { %491 = vrot.lane.b32.xlu1 %v489_v63, %s3179_s25 }
 0x59b   :  { %v492_v0 = vpop.permute.xlu1 %491 }
 0x59c   :  { %494 = vst.msk [vmem:[#allocation2 + $0x8] sm:$0xff] %vm279_vm2, %v492_v0  ;;  %2741 = vmatmul.mubr.msk.f32.vlgmr.msra.gmra.mxu0 %vm279_vm2, %v492_v0 }
 0x59d   :  { %2755 = vmatpush3.msra.mxu0 %v3295_v3  ;;  %2762 = vmatprep.mubr.msk.f32.mxu0 %vm3176_vm3, %v3175_v5 }
 0x59e   :  { %2756 = vmatprep.subr.mxu0 %v3175_v5 }
 0x59f   :  { %2757 = vmatpush3.msra.mxu0 %v3307_v6 }
 0x5a0   :  { %2758 = vmatprep.subr.mxu0 %v3175_v5 }
 0x5a1   :  { %2759 = vmatpush3.msra.mxu0 %v3325_v10 }
 0x5a2   :  { %2760 = vmatprep.subr.mxu0 %v3175_v5 }
 0x5a3   :  { %2761 = vmatpush3.msra.mxu0 %v3334_v11 }
 0x5a4   :  { %2776 = vmatprep.subr.mxu0 %v3175_v5 }
 0x65c   :  { %v563_v4 = vpop.f32.mrf.mxu0 }
 0x65d   :  { %v574_v7 = vadd.f32 %v563_v4, %v3378_v18  ;;  %v567_v12 = vadd.f32 %v563_v4, %v240_v9 }
 0x65e   :  { %v2742_v8 = vpop.f32.mrf.mxu0 }
 0x65f   :  { %576 = vrot.lane.b32.xlu0 %v574_v7, %s3177_s3  ;;  %v2510_v13 = vmul.f32 -1.442695, %v567_v12 }
 0x661   :  { %2954 = vpow2.f32 %v2510_v13 }
 0x66e   :  { %v2955_v19 = vpop.eup %2954 }
 0x66f   :  { %v571_v20 = vadd.f32 1.0, %v2955_v19 }
 0x671   :  { %2956 = vrcp.f32 %v571_v20 }
 0x67e   :  { %v2957_v21 = vpop.eup %2956 }
 0x67f   :  { %v586_v28 = vsub.f32 1.0, %v2957_v21  ;;  %v592_v30 = vmul.f32 %v2957_v21, %v489_v63 }
 0x6d1   :  { %v577_v22 = vpop.permute.xlu0 %576 }
 0x6d2   :  { %v579_v23 = vmul.f32 %v2957_v21, %v577_v22  ;;  %v255_v21 = vadd.f32 %v3370_v14, %v3386_v24 }
 0x6d4   :  { %581 = vrot.lane.b32.xlu1 %v579_v23, %s3177_s3 }
 0x746   :  { %v582_v25 = vpop.permute.xlu1 %581 }
 0x747   :  { %v584_v26 = vadd.f32 %v582_v25, %v240_v9 }
 0x749   :  { %2958 = vtanh.f32 %v584_v26 }
 0x756   :  { %v2959_v27 = vpop.eup %2958 }
 0x757   :  { %588 = vrot.lane.b32.xlu0 %v2959_v27, %s3179_s25 }
 0x7c9   :  { %v589_v29 = vpop.permute.xlu0 %588 }
 0x7ca   :  { %v591_v31 = vmul.f32 %v589_v29, %v586_v28  ;;  %v1130_v29 = vld [vmem:[%s3790_s6 + $0x18] sm:$0xff] }
 0x7cc   :  { %v593_v32 = vadd.f32 %v592_v30, %v591_v31 }
 0x7ce   :  { %595 = vrot.lane.b32.xlu1 %v593_v32, %s3179_s25 }
 0x840   :  { %v596_v33 = vpop.permute.xlu1 %595 }
 0x841   :  { %598 = vst.msk [vmem:[#allocation2 + $0x10] sm:$0xff] %vm279_vm2, %v596_v33  ;;  %2752 = vmatmul.mubr.msk.f32.vlgmr.msra.gmra.mxu1 %vm279_vm2, %v596_v33 }
 0x842   :  { %2766 = vmatpush3.msra.mxu1 %v3295_v3  ;;  %2773 = vmatprep.mubr.msk.f32.mxu1 %vm3176_vm3, %v3175_v5 }
 0x843   :  { %2767 = vmatprep.subr.mxu1 %v3175_v5 }
 0x844   :  { %2768 = vmatpush3.msra.mxu1 %v3307_v6 }
 0x845   :  { %2769 = vmatprep.subr.mxu1 %v3175_v5 }
 0x846   :  { %2770 = vmatpush3.msra.mxu1 %v3325_v10 }
 0x847   :  { %2771 = vmatprep.subr.mxu1 %v3175_v5 }
 0x848   :  { %2772 = vmatpush3.msra.mxu1 %v3334_v11 }
 0x849   :  { %2787 = vmatprep.subr.mxu1 %v3175_v5 }
 0x901   :  { %v667_v34 = vpop.f32.mrf.mxu1 }
 0x902   :  { %v678_v35 = vadd.f32 %v667_v34, %v3378_v18  ;;  %v671_v38 = vadd.f32 %v667_v34, %v245_v37 }
 0x903   :  { %v2753_v36 = vpop.f32.mrf.mxu1 }
 0x904   :  { %680 = vrot.lane.b32.xlu0 %v678_v35, %s3177_s3  ;;  %v2512_v39 = vmul.f32 -1.442695, %v671_v38  ;;  %v1129_v36 = vld [vmem:[%s3790_s6 + $0x10] sm:$0xff]  ;;  %v1128_v38 = vld [vmem:[%s3790_s6 + $0x8] sm:$0xff] }
 0x906   :  { %2960 = vpow2.f32 %v2512_v39  ;;  %v1127_v39 = vld [vmem:[%s3790_s6] sm:$0xff] }
 0x913   :  { %v2961_v40 = vpop.eup %2960 }
 0x914   :  { %v675_v41 = vadd.f32 1.0, %v2961_v40  ;;  %v1120_v40 = vld [vmem:[#allocation2 + $0x8] sm:$0xff] }
 0x916   :  { %2962 = vrcp.f32 %v675_v41  ;;  %v1121_v41 = vld [vmem:[#allocation2 + $0x10] sm:$0xff] }
 0x923   :  { %v2963_v42 = vpop.eup %2962 }
 0x924   :  { %v690_v48 = vsub.f32 1.0, %v2963_v42  ;;  %v696_v50 = vmul.f32 %v2963_v42, %v593_v32 }
 0x976   :  { %v681_v43 = vpop.permute.xlu0 %680 }
 0x977   :  { %v683_v44 = vmul.f32 %v2963_v42, %v681_v43 }
 0x979   :  { %685 = vrot.lane.b32.xlu1 %v683_v44, %s3177_s3 }
 0x9eb   :  { %v686_v45 = vpop.permute.xlu1 %685 }
 0x9ec   :  { %v688_v46 = vadd.f32 %v686_v45, %v245_v37  ;;  %v1119_v37 = vld [vmem:[#allocation2] sm:$0xff] }
 0x9ee   :  { %2964 = vtanh.f32 %v688_v46 }
 0x9fb   :  { %v2965_v47 = vpop.eup %2964 }
 0x9fc   :  { %692 = vrot.lane.b32.xlu0 %v2965_v47, %s3179_s25 }
 0xa6e   :  { %v693_v49 = vpop.permute.xlu0 %692 }
 0xa6f   :  { %v695_v51 = vmul.f32 %v693_v49, %v690_v48  ;;  %v260_v48 = vadd.f32 %v3386_v24, %v3376_v17  ;;  %v3526_v17 = vld [vmem:[#allocation4 + $0x10] sm:$0xff] }
 0xa71   :  { %v697_v52 = vadd.f32 %v696_v50, %v695_v51 }
 0xa73   :  { %699 = vrot.lane.b32.xlu1 %v697_v52, %s3179_s25 }
 0xae5   :  { %v700_v53 = vpop.permute.xlu1 %699 }
 0xae6   :  { %702 = vst.msk [vmem:[#allocation2 + $0x18] sm:$0xff] %vm279_vm2, %v700_v53  ;;  %2763 = vmatmul.mubr.msk.f32.vlgmr.msra.gmra.mxu0 %vm279_vm2, %v700_v53 }
 0xae7   :  { %2777 = vmatpush3.msra.mxu0 %v3295_v3  ;;  %2784 = vmatprep.mubr.msk.f32.mxu0 %vm3176_vm3, %v3175_v5 }
 0xae8   :  { %2778 = vmatprep.subr.mxu0 %v3175_v5 }
 0xae9   :  { %2779 = vmatpush3.msra.mxu0 %v3307_v6 }
 0xaea   :  { %2780 = vmatprep.subr.mxu0 %v3175_v5 }
 0xaeb   :  { %2781 = vmatpush3.msra.mxu0 %v3325_v10 }
 0xaec   :  { %2782 = vmatprep.subr.mxu0 %v3175_v5 }
 0xaed   :  { %2783 = vmatpush3.msra.mxu0 %v3334_v11  ;;  %v1122_v42 = vld [vmem:[#allocation2 + $0x18] sm:$0xff] }
 0xaee   :  { %2798 = vmatprep.subr.mxu0 %v1130_v29 }
 0xba6   :  { %v771_v54 = vpop.f32.mrf.mxu0 }
 0xba7   :  { %v782_v55 = vadd.f32 %v771_v54, %v3378_v18  ;;  %v775_v58 = vadd.f32 %v771_v54, %v250_v57 }
 0xba8   :  { %v2764_v56 = vpop.f32.mrf.mxu0 }
 0xba9   :  { %784 = vrot.lane.b32.xlu0 %v782_v55, %s3177_s3  ;;  %v2514_v59 = vmul.f32 -1.442695, %v775_v58 }
 0xbab   :  { %2966 = vpow2.f32 %v2514_v59  ;;  %v3523_v59 = vld [vmem:[#allocation4 + $0x18] sm:$0xff] }
 0xbb8   :  { %v2967_v60 = vpop.eup %2966 }
 0xbb9   :  { %v779_v61 = vadd.f32 1.0, %v2967_v60  ;;  %v3530_v60 = vld [vmem:[#allocation4 + $0x8] sm:$0xff] }
 0xbbb   :  { %2968 = vrcp.f32 %v779_v61  ;;  %v3534_v61 = vld [vmem:[#allocation4] sm:$0xff] }
 0xbc8   :  { %v2969_v62 = vpop.eup %2968 }
 0xbc9   :  { %v794_v7 = vsub.f32 1.0, %v2969_v62  ;;  %v800_v15 = vmul.f32 %v2969_v62, %v697_v52 }
 0xc1b   :  { %v785_v63 = vpop.permute.xlu0 %784 }
 0xc1c   :  { %v787_v0 = vmul.f32 %v2969_v62, %v785_v63 }
 0xc1e   :  { %789 = vrot.lane.b32.xlu1 %v787_v0, %s3177_s3  ;;  %v2530_v0 = vld [vmem:[%s3793_s9] ss:$0 sm:$0xff] }
 0xc90   :  { %v790_v1 = vpop.permute.xlu1 %789 }
 0xc91   :  { %v792_v2 = vadd.f32 %v790_v1, %v250_v57 }
 0xc93   :  { %2970 = vtanh.f32 %v792_v2 }
 0xca0   :  { %v2971_v4 = vpop.eup %2970 }
 0xca1   :  { %796 = vrot.lane.b32.xlu0 %v2971_v4, %s3179_s25 }
 0xd13   :  { %v797_v8 = vpop.permute.xlu0 %796 }
 0xd14   :  { %v799_v9 = vmul.f32 %v797_v8, %v794_v7  ;;  %v2531_v8 = vld [vmem:[%s3785_s1 + $0x8] sm:$0xff] }
 0xd16   :  { %v801_v12 = vadd.f32 %v800_v15, %v799_v9 }
 0xd18   :  { %803 = vrot.lane.b32.xlu1 %v801_v12, %s3179_s25 }
 0xd8a   :  { %v804_v13 = vpop.permute.xlu1 %803 }
 0xd8b   :  { %806 = vst.msk [vmem:[#allocation2 + $0x20] sm:$0xff] %vm279_vm2, %v804_v13  ;;  %2774 = vmatmul.mubr.msk.f32.vlgmr.msra.gmra.mxu1 %vm279_vm2, %v804_v13 }
 0xd8c   :  { %2788 = vmatpush3.msra.mxu1 %v3295_v3  ;;  %2795 = vmatprep.mubr.msk.f32.mxu1 %vm3176_vm3, %v3175_v5 }
 0xd8d   :  { %2789 = vmatprep.subr.mxu1 %v3175_v5 }
 0xd8e   :  { %2790 = vmatpush3.msra.mxu1 %v3307_v6 }
 0xd8f   :  { %2791 = vmatprep.subr.mxu1 %v3175_v5 }
 0xd90   :  { %2792 = vmatpush3.msra.mxu1 %v3325_v10 }
 0xd91   :  { %2793 = vmatprep.subr.mxu1 %v3175_v5 }
 0xd92   :  { %2794 = vmatpush3.msra.mxu1 %v3334_v11  ;;  %v1123_v43 = vld [vmem:[#allocation2 + $0x20] sm:$0xff] }
 0xd93   :  { %2818 = vmatprep.subr.mxu1 %v3175_v5 }
 0xe4b   :  { %v875_v19 = vpop.f32.mrf.mxu1 }
 0xe4c   :  { %v886_v3 = vadd.f32 %v875_v19, %v3378_v18  ;;  %v879_v6 = vadd.f32 %v875_v19, %v255_v21 }
 0xe4d   :  { %v2775_v20 = vpop.f32.mrf.mxu1 }
 0xe4e   :  { %888 = vrot.lane.b32.xlu0 %v886_v3, %s3177_s3  ;;  %v2516_v22 = vmul.f32 -1.442695, %v879_v6 }
 0xe50   :  { %2972 = vpow2.f32 %v2516_v22  ;;  %v3584_v22 = vld [vmem:[%s3792_s8] ss:$0 sm:$0xff] }
 0xe5d   :  { %v2973_v23 = vpop.eup %2972 }
 0xe5e   :  { %v883_v10 = vadd.f32 1.0, %v2973_v23 }
 0xe60   :  { %2974 = vrcp.f32 %v883_v10 }
 0xe6d   :  { %v2975_v25 = vpop.eup %2974 }
 0xe6e   :  { %v898_v30 = vsub.f32 1.0, %v2975_v25  ;;  %v904_v32 = vmul.f32 %v2975_v25, %v801_v12 }
 0xec0   :  { %v889_v26 = vpop.permute.xlu0 %888 }
 0xec1   :  { %v891_v11 = vmul.f32 %v2975_v25, %v889_v26 }
 0xec3   :  { %893 = vrot.lane.b32.xlu1 %v891_v11, %s3177_s3 }
 0xf35   :  { %v894_v27 = vpop.permute.xlu1 %893 }
 0xf36   :  { %v896_v28 = vadd.f32 %v894_v27, %v255_v21 }
 0xf38   :  { %2976 = vtanh.f32 %v896_v28 }
 0xf45   :  { %v2977_v14 = vpop.eup %2976 }
 0xf46   :  { %900 = vrot.lane.b32.xlu0 %v2977_v14, %s3179_s25 }
 0xfb8   :  { %v901_v31 = vpop.permute.xlu0 %900 }
 0xfb9   :  { %v903_v33 = vmul.f32 %v901_v31, %v898_v30  ;;  %v265_v30 = vadd.f32 %v3374_v16, %v3386_v24 }
 0xfbb   :  { %v3495_v34 = vadd.f32 %v904_v32, %v903_v33 }
 0xfbd   :  { %907 = vrot.lane.b32.xlu1 %v3495_v34, %s3179_s25 }
0x102f   :  { %v908_v35 = vpop.permute.xlu1 %907 }
0x1030   :  { %910 = vst.msk [vmem:[#allocation2 + $0x28] sm:$0xff] %vm279_vm2, %v908_v35  ;;  %2785 = vmatmul.mubr.msk.f32.vlgmr.msra.gmra.mxu0 %vm279_vm2, %v908_v35 }
0x1031   :  { %2799 = vmatpush3.msra.mxu0 %v1130_v29  ;;  %2806 = vmatprep.mubr.msk.f32.mxu0 %vm279_vm2, %v1119_v37 }
0x1032   :  { %2800 = vmatprep.subr.mxu0 %v1129_v36 }
0x1033   :  { %2801 = vmatpush3.msra.mxu0 %v1129_v36 }
0x1034   :  { %2802 = vmatprep.subr.mxu0 %v1128_v38 }
0x1035   :  { %2803 = vmatpush3.msra.mxu0 %v1128_v38 }
0x1036   :  { %2804 = vmatprep.subr.mxu0 %v1127_v39 }
0x1037   :  { %2805 = vmatpush3.msra.mxu0 %v1127_v39  ;;  %v1124_v44 = vld [vmem:[#allocation2 + $0x28] sm:$0xff] }
0x1038   :  { %2807 = vmatmul.mubr.msk.f32.vlgmr.msra.gmra.mxu0 %vm279_vm2, %v1120_v40  ;;  %2840 = vmatprep.subr.mxu0 %v3175_v5 }
0x1039   :  { %2809 = vmatprep.mubr.msk.f32.mxu0 %vm279_vm2, %v1121_v41  ;;  %2841 = vmatpush3.msra.mxu0 %v3523_v59 }
0x103a   :  { %2842 = vmatprep.subr.mxu0 %v3175_v5 }
0x103b   :  { %2843 = vmatpush3.msra.mxu0 %v3526_v17 }
0x103c   :  { %2810 = vmatmul.mubr.msk.f32.gmra.mxu0 %vm279_vm2, %v1122_v42  ;;  %2844 = vmatprep.subr.mxu0 %v3175_v5 }
0x103d   :  { %2812 = vmatprep.mubr.msk.f32.mxu0 %vm279_vm2, %v1123_v43  ;;  %2845 = vmatpush3.msra.mxu0 %v3530_v60 }
0x103e   :  { %2846 = vmatprep.subr.mxu0 %v3175_v5 }
0x103f   :  { %2847 = vmatpush3.msra.mxu0 %v3534_v61 }
0x1040   :  { %2813 = vmatmul.mubr.msk.f32.gmra.mxu0 %vm279_vm2, %v1124_v44  ;;  %2862 = vmatprep.subr.mxu0 %v3175_v5 }
0x10f0   :  { %v979_v45 = vpop.f32.mrf.mxu0 }
0x10f1   :  { %v990_v46 = vadd.f32 %v979_v45, %v3378_v18  ;;  %v983_v49 = vadd.f32 %v979_v45, %v260_v48 }
0x10f2   :  { %v2786_v47 = vpop.f32.mrf.mxu0 }
0x10f3   :  { %992 = vrot.lane.b32.xlu0 %v990_v46, %s3177_s3  ;;  %v2518_v50 = vmul.f32 -1.442695, %v983_v49 }
0x10f5   :  { %2978 = vpow2.f32 %v2518_v50 }
0x10f8   :  { %v3579_v21 = vpop.f32.mrf.mxu0 }
0x10fa   :  { %v1228_v6 = vpop.f32.mrf.mxu0 }
0x10fb   :  { %v1229_v23 = vadd.f32 %v3584_v22, %v1228_v6 }
0x1102   :  { %v2979_v51 = vpop.eup %2978 }
0x1103   :  { %v987_v52 = vadd.f32 1.0, %v2979_v51 }
0x1105   :  { %2980 = vrcp.f32 %v987_v52 }
0x1112   :  { %v2981_v53 = vpop.eup %2980 }
0x1113   :  { %v1002_v62 = vsub.f32 1.0, %v2981_v53  ;;  %v1008_v1 = vmul.f32 %v2981_v53, %v3495_v34 }
0x1165   :  { %v993_v54 = vpop.permute.xlu0 %992 }
0x1166   :  { %v995_v55 = vmul.f32 %v2981_v53, %v993_v54 }
0x1168   :  { %997 = vrot.lane.b32.xlu1 %v995_v55, %s3177_s3 }
0x11da   :  { %v998_v56 = vpop.permute.xlu1 %997 }
0x11db   :  { %v1000_v57 = vadd.f32 %v998_v56, %v260_v48 }
0x11dd   :  { %2982 = vtanh.f32 %v1000_v57 }
0x11ea   :  { %v2983_v58 = vpop.eup %2982 }
0x11eb   :  { %1004 = vrot.lane.b32.xlu0 %v2983_v58, %s3179_s25  ;;  %v1234_v58 = vadd.f32 %v3579_v21, %v3584_v22 }
0x11ef   :  { %1359 = vrot.lane.b32.xlu0 %v2530_v0, %s3177_s3 }
0x125d   :  { %v1005_v63 = vpop.permute.xlu0 %1004 }
0x125e   :  { %v1007_v2 = vmul.f32 %v1005_v63, %v1002_v62 }
0x1260   :  { %v3544_v4 = vadd.f32 %v1008_v1, %v1007_v2 }
0x1261   :  { %v3575_v13 = vpop.permute.xlu0 %1359 }
0x1262   :  { %1011 = vrot.lane.b32.xlu1 %v3544_v4, %s3179_s25 }
0x12d4   :  { %v1012_v7 = vpop.permute.xlu1 %1011 }
0x12d5   :  { %1014 = vst.msk [vmem:[#allocation2 + $0x30] sm:$0xff] %vm279_vm2, %v1012_v7  ;;  %2796 = vmatmul.mubr.msk.f32.vlgmr.msra.gmra.mxu1 %vm279_vm2, %v1012_v7 }
0x12d6   :  { %2819 = vmatpush3.msra.mxu1 %v3523_v59  ;;  %2826 = vmatprep.mubr.msk.f32.mxu1 %vm3176_vm3, %v3175_v5 }
0x12d7   :  { %2820 = vmatprep.subr.mxu1 %v3175_v5 }
0x12d8   :  { %2821 = vmatpush3.msra.mxu1 %v3526_v17 }
0x12d9   :  { %2822 = vmatprep.subr.mxu1 %v3175_v5 }
0x12da   :  { %2823 = vmatpush3.msra.mxu1 %v3530_v60 }
0x12db   :  { %2824 = vmatprep.subr.mxu1 %v3175_v5 }
0x12dc   :  { %2825 = vmatpush3.msra.mxu1 %v3534_v61  ;;  %v1125_v15 = vld [vmem:[#allocation2 + $0x30] sm:$0xff] }
0x12dd   :  { %2827 = vmatmul.mubr.msk.f32.vlgmr.msra.gmra.mxu1 %vm279_vm2, %v2531_v8  ;;  %2815 = vmatprep.mubr.msk.f32.mxu0 %vm279_vm2, %v1125_v15 }
0x12de   :  { %2829 = vmatprep.subr.mxu1 %v3175_v5  ;;  %2837 = vmatprep.mubr.msk.f32.mxu1 %vm3176_vm3, %v3175_v5 }
0x12df   :  { %2830 = vmatpush3.msra.mxu1 %v3523_v59 }
0x12e0   :  { %2831 = vmatprep.subr.mxu1 %v3175_v5 }
0x12e1   :  { %2832 = vmatpush3.msra.mxu1 %v3526_v17 }
0x12e2   :  { %2833 = vmatprep.subr.mxu1 %v3175_v5 }
0x12e3   :  { %2834 = vmatpush3.msra.mxu1 %v3530_v60 }
0x12e4   :  { %2835 = vmatprep.subr.mxu1 %v3175_v5 }
0x12e5   :  { %2836 = vmatpush3.msra.mxu1 %v3534_v61 }
0x12e6   :  { %2851 = vmatprep.subr.mxu1 %v3175_v5 }
0x1395   :  { %v1083_v9 = vpop.f32.mrf.mxu1 }
0x1396   :  { %v1094_v14 = vadd.f32 %v1083_v9, %v3378_v18  ;;  %v1087_v31 = vadd.f32 %v1083_v9, %v265_v30 }
0x1397   :  { %v2797_v12 = vpop.f32.mrf.mxu1 }
0x1398   :  { %v2520_v32 = vmul.f32 -1.442695, %v1087_v31 }
0x139d   :  { %v1348_v19 = vpop.f32.mrf.mxu1 }
0x139e   :  { %v1362_v3 = vadd.f32 %v3575_v13, %v1348_v19  ;;  %v1352_v10 = vadd.f32 %v1348_v19, %v1229_v23 }
0x139f   :  { %v2828_v20 = vpop.f32.mrf.mxu1 }
0x13a0   :  { %1364 = vrot.lane.b32.xlu1 %v1362_v3, %s3177_s3  ;;  %v2533_v25 = vmul.f32 -1.442695, %v1352_v10 }
0x13a2   :  { %2984 = vpow2.f32 %v2533_v25 }
0x13af   :  { %v2985_v26 = vpop.eup %2984 }
0x13b0   :  { %v1356_v11 = vadd.f32 1.0, %v2985_v26 }
0x13b2   :  { %2986 = vrcp.f32 %v1356_v11 }
0x13b3   :  { %2988 = vpow2.f32 %v2520_v32 }
0x13bf   :  { %v2987_v27 = vpop.eup %2986 }
0x13c0   :  { %v2989_v33 = vpop.eup %2988  ;;  %v1374_v24 = vsub.f32 1.0, %v2987_v27 }
0x13c1   :  { %v1091_v34 = vadd.f32 1.0, %v2989_v33 }
0x13c3   :  { %2990 = vrcp.f32 %v1091_v34 }
0x13d0   :  { %v2991_v38 = vpop.eup %2990 }
0x13d1   :  { %v1106_v48 = vsub.f32 1.0, %v2991_v38  ;;  %v1112_v50 = vmul.f32 %v2991_v38, %v3544_v4 }
0x1412   :  { %v1365_v28 = vpop.permute.xlu1 %1364 }
0x1413   :  { %v1367_v29 = vmul.f32 %v2987_v27, %v1365_v28 }
0x1415   :  { %1369 = vrot.lane.b32.xlu0 %v1367_v29, %s3177_s3 }
0x1419   :  { %1380 = vrot.lane.b32.xlu0 %v2531_v8, %s3178_s5 }
0x141d   :  { %1096 = vrot.lane.b32.xlu0 %v1094_v14, %s3177_s3 }
0x1487   :  { %v1370_v35 = vpop.permute.xlu0 %1369 }
0x1488   :  { %v1372_v36 = vadd.f32 %v1370_v35, %v1229_v23  ;;  %v2811_v23 = vpop.f32.mrf.mxu0 }
0x148a   :  { %2992 = vtanh.f32 %v1372_v36  ;;  %v1238_v10 = vpop.f32.mrf.mxu0 }
0x148b   :  { %v1381_v37 = vpop.permute.xlu0 %1380 }
0x148c   :  { %v1383_v43 = vmul.f32 %v2987_v27, %v1381_v37  ;;  %v3634_v25 = vpop.f32.mrf.mxu0 }
0x148e   :  { %v3636_v26 = vpop.f32.mrf.mxu0 }
0x148f   :  { %v1097_v39 = vpop.permute.xlu0 %1096 }
0x1490   :  { %v1099_v40 = vmul.f32 %v2991_v38, %v1097_v39 }
0x1492   :  { %1101 = vrot.lane.b32.xlu0 %v1099_v40, %s3177_s3 }
0x1497   :  { %v2993_v18 = vpop.eup %2992 }
0x1498   :  { %1376 = vrot.lane.b32.xlu1 %v2993_v18, %s3179_s25 }
0x1504   :  { %v1102_v41 = vpop.permute.xlu0 %1101 }
0x1505   :  { %v1104_v16 = vadd.f32 %v1102_v41, %v265_v30  ;;  %v1239_v30 = vadd.f32 %v3584_v22, %v1238_v10 }
0x1507   :  { %2994 = vtanh.f32 %v1104_v16 }
0x150a   :  { %v1377_v42 = vpop.permute.xlu1 %1376 }
0x150b   :  { %v1379_v44 = vmul.f32 %v1377_v42, %v1374_v24 }
0x150d   :  { %v1384_v45 = vadd.f32 %v1383_v43, %v1379_v44 }
0x150f   :  { %1386 = vrot.lane.b32.xlu1 %v1384_v45, %s3179_s25 }
0x1514   :  { %v2995_v46 = vpop.eup %2994 }
0x1515   :  { %1108 = vrot.lane.b32.xlu0 %v2995_v46, %s3179_s25 }
0x1581   :  { %v1387_v47 = vpop.permute.xlu1 %1386 }
0x1582   :  { %1389 = vst.msk [vmem:[#allocation3] sm:$0xff] %vm279_vm2, %v1387_v47  ;;  %2838 = vmatmul.mubr.msk.f32.vlgmr.msra.gmra.mxu1 %vm279_vm2, %v1387_v47  ;;  %v1244_v47 = vadd.f32 %v2811_v23, %v3584_v22 }
0x1583   :  { %2852 = vmatpush3.msra.mxu1 %v3523_v59  ;;  %2859 = vmatprep.mubr.msk.f32.mxu1 %vm3176_vm3, %v3175_v5 }
0x1584   :  { %2853 = vmatprep.subr.mxu1 %v3175_v5 }
0x1585   :  { %2854 = vmatpush3.msra.mxu1 %v3526_v17 }
0x1586   :  { %2855 = vmatprep.subr.mxu1 %v3175_v5 }
0x1587   :  { %v1109_v49 = vpop.permute.xlu0 %1108  ;;  %2856 = vmatpush3.msra.mxu1 %v3530_v60 }
0x1588   :  { %v1111_v51 = vmul.f32 %v1109_v49, %v1106_v48  ;;  %2857 = vmatprep.subr.mxu1 %v3175_v5 }
0x1589   :  { %2858 = vmatpush3.msra.mxu1 %v3534_v61 }
0x158a   :  { %v1113_v52 = vadd.f32 %v1112_v50, %v1111_v51  ;;  %2873 = vmatprep.subr.mxu1 %v3175_v5 }
0x158c   :  { %1115 = vrot.lane.b32.xlu0 %v1113_v52, %s3179_s25 }
0x15fe   :  { %v1116_v53 = vpop.permute.xlu0 %1115 }
0x15ff   :  { %1118 = vst.msk [vmem:[#allocation2 + $0x38] sm:$0xff] %vm279_vm2, %v1116_v53 }
0x1606   :  { %v1126_v54 = vld [vmem:[#allocation2 + $0x38] sm:$0xff] }
0x1607   :  { %2816 = vmatmul.mubr.msk.f32.gmra.mxu0 %vm279_vm2, %v1126_v54 }
0x1608   :  { %2848 = vmatprep.mubr.msk.f32.mxu0 %vm3176_vm3, %v3175_v5 }
0x1642   :  { %v1458_v55 = vpop.f32.mrf.mxu1 }
0x1643   :  { %v1469_v56 = vadd.f32 %v1458_v55, %v3575_v13  ;;  %v1462_v62 = vadd.f32 %v1458_v55, %v1234_v58 }
0x1644   :  { %v2839_v57 = vpop.f32.mrf.mxu1 }
0x1645   :  { %1471 = vrot.lane.b32.xlu1 %v1469_v56, %s3177_s3  ;;  %v2535_v63 = vmul.f32 -1.442695, %v1462_v62 }
0x1647   :  { %2996 = vpow2.f32 %v2535_v63 }
0x1654   :  { %v2997_v0 = vpop.eup %2996 }
0x1655   :  { %v1466_v1 = vadd.f32 1.0, %v2997_v0 }
0x1657   :  { %2998 = vrcp.f32 %v1466_v1 }
0x1664   :  { %v2999_v2 = vpop.eup %2998 }
0x1665   :  { %v1481_v12 = vsub.f32 1.0, %v2999_v2  ;;  %v1487_v3 = vmul.f32 %v2999_v2, %v1384_v45 }
0x16b7   :  { %v1472_v4 = vpop.permute.xlu1 %1471 }
0x16b8   :  { %v1474_v7 = vmul.f32 %v2999_v2, %v1472_v4 }
0x16ba   :  { %1476 = vrot.lane.b32.xlu1 %v1474_v7, %s3177_s3 }
0x16c7   :  { %v3638_v11 = vpop.f32.mrf.mxu0 }
0x16c9   :  { %v3640_v27 = vpop.f32.mrf.mxu0 }
0x172c   :  { %v1477_v8 = vpop.permute.xlu1 %1476 }
0x172d   :  { %v1479_v15 = vadd.f32 %v1477_v8, %v1234_v58 }
0x172f   :  { %3000 = vtanh.f32 %v1479_v15  ;;  %v1249_v15 = vadd.f32 %v3584_v22, %v3636_v26 }
0x173c   :  { %v3001_v9 = vpop.eup %3000 }
0x173d   :  { %1483 = vrot.lane.b32.xlu1 %v3001_v9, %s3179_s25 }
0x17af   :  { %v1484_v19 = vpop.permute.xlu1 %1483 }
0x17b0   :  { %v1486_v20 = vmul.f32 %v1484_v19, %v1481_v12 }
0x17b2   :  { %v1488_v21 = vadd.f32 %v1487_v3, %v1486_v20 }
0x17b4   :  { %1492 = vrot.lane.b32.xlu1 %v1488_v21, %s3179_s25  ;;  %1490 = vst.msk [vmem:[#allocation3] sm:$0xff] %vm1489_vm4, %v1488_v21 }
0x1826   :  { %v1493_v6 = vpop.permute.xlu1 %1492 }
0x1827   :  { %2849 = vmatmul.mubr.msk.f32.vlgmr.msra.gmra.mxu0 %vm279_vm2, %v1493_v6 }
0x1828   :  { %2863 = vmatpush3.msra.mxu0 %v3523_v59  ;;  %2870 = vmatprep.mubr.msk.f32.mxu0 %vm3176_vm3, %v3175_v5 }
0x1829   :  { %2864 = vmatprep.subr.mxu0 %v3175_v5 }
0x182a   :  { %2865 = vmatpush3.msra.mxu0 %v3526_v17 }
0x182b   :  { %2866 = vmatprep.subr.mxu0 %v3175_v5 }
0x182c   :  { %2867 = vmatpush3.msra.mxu0 %v3530_v60 }
0x182d   :  { %2868 = vmatprep.subr.mxu0 %v3175_v5 }
0x182e   :  { %2869 = vmatpush3.msra.mxu0 %v3534_v61 }
0x182f   :  { %2884 = vmatprep.subr.mxu0 %v3175_v5 }
0x18e7   :  { %v1562_v28 = vpop.f32.mrf.mxu0 }
0x18e8   :  { %v1573_v29 = vadd.f32 %v1562_v28, %v3575_v13  ;;  %v1566_v31 = vadd.f32 %v1562_v28, %v1239_v30 }
0x18e9   :  { %v2850_v14 = vpop.f32.mrf.mxu0 }
0x18ea   :  { %1575 = vrot.lane.b32.xlu0 %v1573_v29, %s3177_s3  ;;  %v2537_v32 = vmul.f32 -1.442695, %v1566_v31 }
0x18ec   :  { %3002 = vpow2.f32 %v2537_v32 }
0x18f9   :  { %v3003_v33 = vpop.eup %3002 }
0x18fa   :  { %v1570_v34 = vadd.f32 1.0, %v3003_v33 }
0x18fc   :  { %3004 = vrcp.f32 %v1570_v34 }
0x1909   :  { %v3005_v35 = vpop.eup %3004 }
0x190a   :  { %v1585_v18 = vsub.f32 1.0, %v3005_v35  ;;  %v1591_v16 = vmul.f32 %v3005_v35, %v1488_v21 }
0x195c   :  { %v1576_v36 = vpop.permute.xlu0 %1575 }
0x195d   :  { %v1578_v37 = vmul.f32 %v3005_v35, %v1576_v36 }
0x195f   :  { %1580 = vrot.lane.b32.xlu1 %v1578_v37, %s3177_s3 }
0x19d1   :  { %v1581_v38 = vpop.permute.xlu1 %1580 }
0x19d2   :  { %v1583_v39 = vadd.f32 %v1581_v38, %v1239_v30 }
0x19d4   :  { %3006 = vtanh.f32 %v1583_v39 }
0x19e1   :  { %v3007_v40 = vpop.eup %3006 }
0x19e2   :  { %1587 = vrot.lane.b32.xlu0 %v3007_v40, %s3179_s25 }
0x1a54   :  { %v1588_v41 = vpop.permute.xlu0 %1587 }
0x1a55   :  { %v1590_v24 = vmul.f32 %v1588_v41, %v1585_v18 }
0x1a57   :  { %v3647_v42 = vadd.f32 %v1591_v16, %v1590_v24 }
0x1a59   :  { %1599 = vrot.lane.b32.xlu1 %v3647_v42, %s3179_s25 }
0x1acb   :  { %v1600_v43 = vpop.permute.xlu1 %1599 }
0x1acc   :  { %2860 = vmatmul.mubr.msk.f32.vlgmr.msra.gmra.mxu1 %vm279_vm2, %v1600_v43 }
0x1acd   :  { %2874 = vmatpush3.msra.mxu1 %v3523_v59  ;;  %2881 = vmatprep.mubr.msk.f32.mxu1 %vm3176_vm3, %v3175_v5 }
0x1ace   :  { %2875 = vmatprep.subr.mxu1 %v3175_v5 }
0x1acf   :  { %2876 = vmatpush3.msra.mxu1 %v3526_v17 }
0x1ad0   :  { %2877 = vmatprep.subr.mxu1 %v3175_v5 }
0x1ad1   :  { %2878 = vmatpush3.msra.mxu1 %v3530_v60 }
0x1ad2   :  { %2879 = vmatprep.subr.mxu1 %v3175_v5 }
0x1ad3   :  { %2880 = vmatpush3.msra.mxu1 %v3534_v61 }
0x1ad4   :  { %2895 = vmatprep.subr.mxu1 %v3175_v5 }
0x1b8c   :  { %v1669_v44 = vpop.f32.mrf.mxu1 }
0x1b8d   :  { %v1680_v45 = vadd.f32 %v1669_v44, %v3575_v13  ;;  %v1673_v48 = vadd.f32 %v1669_v44, %v1244_v47 }
0x1b8e   :  { %v2861_v46 = vpop.f32.mrf.mxu1 }
0x1b8f   :  { %1682 = vrot.lane.b32.xlu0 %v1680_v45, %s3177_s3  ;;  %v2539_v49 = vmul.f32 -1.442695, %v1673_v48 }
0x1b91   :  { %3008 = vpow2.f32 %v2539_v49  ;;  %v1259_v49 = vadd.f32 %v3584_v22, %v3640_v27 }
0x1b9e   :  { %v3009_v50 = vpop.eup %3008 }
0x1b9f   :  { %v1677_v51 = vadd.f32 1.0, %v3009_v50 }
0x1ba1   :  { %3010 = vrcp.f32 %v1677_v51 }
0x1bae   :  { %v3011_v52 = vpop.eup %3010 }
0x1baf   :  { %v1692_v58 = vsub.f32 1.0, %v3011_v52  ;;  %v1698_v63 = vmul.f32 %v3011_v52, %v3647_v42 }
0x1c01   :  { %v1683_v53 = vpop.permute.xlu0 %1682 }
0x1c02   :  { %v1685_v54 = vmul.f32 %v3011_v52, %v1683_v53 }
0x1c04   :  { %1687 = vrot.lane.b32.xlu1 %v1685_v54, %s3177_s3 }
0x1c76   :  { %v1688_v55 = vpop.permute.xlu1 %1687 }
0x1c77   :  { %v1690_v56 = vadd.f32 %v1688_v55, %v1244_v47 }
0x1c79   :  { %3012 = vtanh.f32 %v1690_v56 }
0x1c86   :  { %v3013_v57 = vpop.eup %3012 }
0x1c87   :  { %1694 = vrot.lane.b32.xlu0 %v3013_v57, %s3179_s25 }
0x1cf9   :  { %v1695_v62 = vpop.permute.xlu0 %1694 }
0x1cfa   :  { %v1697_v0 = vmul.f32 %v1695_v62, %v1692_v58 }
0x1cfc   :  { %v3668_v1 = vadd.f32 %v1698_v63, %v1697_v0 }
0x1cfe   :  { %1706 = vrot.lane.b32.xlu1 %v3668_v1, %s3179_s25 }
0x1d70   :  { %v1707_v2 = vpop.permute.xlu1 %1706 }
0x1d71   :  { %2871 = vmatmul.mubr.msk.f32.vlgmr.msra.gmra.mxu0 %vm279_vm2, %v1707_v2 }
0x1d72   :  { %2885 = vmatpush3.msra.mxu0 %v3523_v59  ;;  %2892 = vmatprep.mubr.msk.f32.mxu0 %vm3176_vm3, %v3175_v5 }
0x1d73   :  { %2886 = vmatprep.subr.mxu0 %v3175_v5 }
0x1d74   :  { %2887 = vmatpush3.msra.mxu0 %v3526_v17 }
0x1d75   :  { %2888 = vmatprep.subr.mxu0 %v3175_v5 }
0x1d76   :  { %2889 = vmatpush3.msra.mxu0 %v3530_v60 }
0x1d77   :  { %2890 = vmatprep.subr.mxu0 %v3175_v5 }
0x1d78   :  { %2891 = vmatpush3.msra.mxu0 %v3534_v61 }
0x1e31   :  { %v1776_v4 = vpop.f32.mrf.mxu0 }
0x1e32   :  { %v1787_v7 = vadd.f32 %v1776_v4, %v3575_v13  ;;  %v1780_v9 = vadd.f32 %v1776_v4, %v1249_v15 }
0x1e33   :  { %v2872_v8 = vpop.f32.mrf.mxu0 }
0x1e34   :  { %1789 = vrot.lane.b32.xlu0 %v1787_v7, %s3177_s3  ;;  %v2541_v12 = vmul.f32 -1.442695, %v1780_v9 }
0x1e36   :  { %3014 = vpow2.f32 %v2541_v12  ;;  %v1264_v12 = vadd.f32 %v3638_v11, %v3584_v22  ;;  %v2158_v11 = vld [vmem:[#allocation7 + $0xf8] sm:$0xff] }
0x1e37   :  { %2203 = vmatprep.subr.mxu0 %v2158_v11  ;;  %v2162_v11 = vld [vmem:[#allocation7 + $0x118] sm:$0xff] }
0x1e43   :  { %v3015_v19 = vpop.eup %3014 }
0x1e44   :  { %v1784_v3 = vadd.f32 1.0, %v3015_v19 }
0x1e46   :  { %3016 = vrcp.f32 %v1784_v3 }
0x1e53   :  { %v3017_v20 = vpop.eup %3016 }
0x1e54   :  { %v1799_v29 = vsub.f32 1.0, %v3017_v20  ;;  %v1805_v26 = vmul.f32 %v3017_v20, %v3668_v1 }
0x1ea6   :  { %v1790_v21 = vpop.permute.xlu0 %1789 }
0x1ea7   :  { %v1792_v6 = vmul.f32 %v3017_v20, %v1790_v21 }
0x1ea9   :  { %1794 = vrot.lane.b32.xlu1 %v1792_v6, %s3177_s3 }
0x1f1b   :  { %v1795_v23 = vpop.permute.xlu1 %1794 }
0x1f1c   :  { %v1797_v10 = vadd.f32 %v1795_v23, %v1249_v15 }
0x1f1e   :  { %3018 = vtanh.f32 %v1797_v10 }
0x1f2b   :  { %v3019_v28 = vpop.eup %3018 }
0x1f2c   :  { %1801 = vrot.lane.b32.xlu0 %v3019_v28, %s3179_s25 }
0x1f9e   :  { %v1802_v14 = vpop.permute.xlu0 %1801 }
0x1f9f   :  { %v1804_v30 = vmul.f32 %v1802_v14, %v1799_v29  ;;  %v2157_v29 = vld [vmem:[#allocation7 + $0xf0] sm:$0xff]  ;;  %v2156_v14 = vld [vmem:[#allocation7 + $0xe8] sm:$0xff] }
0x1fa1   :  { %v1806_v31 = vadd.f32 %v1805_v26, %v1804_v30  ;;  %v2155_v26 = vld [vmem:[#allocation7 + $0xe0] sm:$0xff]  ;;  %v2154_v30 = vld [vmem:[#allocation7 + $0xd8] sm:$0xff] }
0x1fa3   :  { %1808 = vrot.lane.b32.xlu1 %v1806_v31, %s3179_s25 }
0x2015   :  { %v1809_v32 = vpop.permute.xlu1 %1808 }
0x2016   :  { %1811 = vst.msk [vmem:[#allocation3 + $0x8] sm:$0xff] %vm279_vm2, %v1809_v32  ;;  %2882 = vmatmul.mubr.msk.f32.vlgmr.msra.gmra.mxu1 %vm279_vm2, %v1809_v32 }
0x2017   :  { %2896 = vmatpush3.msra.mxu1 %v3523_v59  ;;  %2903 = vmatprep.mubr.msk.f32.mxu1 %vm3176_vm3, %v3175_v5  ;;  %v1254_v59 = vadd.f32 %v3634_v25, %v3584_v22 }
0x2018   :  { %2897 = vmatprep.subr.mxu1 %v3175_v5 }
0x2019   :  { %2898 = vmatpush3.msra.mxu1 %v3526_v17 }
0x201a   :  { %2899 = vmatprep.subr.mxu1 %v3175_v5 }
0x201b   :  { %2900 = vmatpush3.msra.mxu1 %v3530_v60 }
0x201c   :  { %2901 = vmatprep.subr.mxu1 %v3175_v5 }
0x201d   :  { %2902 = vmatpush3.msra.mxu1 %v3534_v61 }
0x20d6   :  { %v1880_v33 = vpop.f32.mrf.mxu1 }
0x20d7   :  { %v1891_v34 = vadd.f32 %v1880_v33, %v3575_v13  ;;  %v1884_v36 = vadd.f32 %v1880_v33, %v1254_v59  ;;  %v2152_v33 = vld [vmem:[#allocation7 + $0xc8] sm:$0xff] }
0x20d8   :  { %v2883_v35 = vpop.f32.mrf.mxu1 }
0x20d9   :  { %1893 = vrot.lane.b32.xlu0 %v1891_v34, %s3177_s3  ;;  %v2543_v37 = vmul.f32 -1.442695, %v1884_v36  ;;  %v2151_v34 = vld [vmem:[#allocation7 + $0xc0] sm:$0xff]  ;;  %v2150_v35 = vld [vmem:[#allocation7 + $0xb8] sm:$0xff]  ;;  %v2148_v36 = vld [vmem:[#allocation7 + $0xa8] sm:$0xff] }
0x20db   :  { %3020 = vpow2.f32 %v2543_v37  ;;  %v2147_v37 = vld [vmem:[#allocation7 + $0xa0] sm:$0xff] }
0x20e8   :  { %v3021_v17 = vpop.eup %3020 }
0x20e9   :  { %v1888_v38 = vadd.f32 1.0, %v3021_v17  ;;  %v2146_v17 = vld [vmem:[#allocation7 + $0x98] sm:$0xff] }
0x20eb   :  { %3022 = vrcp.f32 %v1888_v38  ;;  %v2145_v38 = vld [vmem:[#allocation7 + $0x90] sm:$0xff] }
0x20f8   :  { %v3023_v60 = vpop.eup %3022 }
0x20f9   :  { %v1903_v16 = vsub.f32 1.0, %v3023_v60  ;;  %v1909_v25 = vmul.f32 %v3023_v60, %v1806_v31  ;;  %v2153_v31 = vld [vmem:[#allocation7 + $0xd0] sm:$0xff] }
0x214b   :  { %v1894_v39 = vpop.permute.xlu0 %1893 }
0x214c   :  { %v1896_v40 = vmul.f32 %v3023_v60, %v1894_v39  ;;  %v2144_v60 = vld [vmem:[#allocation7 + $0x88] sm:$0xff]  ;;  %v2143_v39 = vld [vmem:[#allocation7 + $0x80] sm:$0xff] }
0x214e   :  { %1898 = vrot.lane.b32.xlu1 %v1896_v40, %s3177_s3  ;;  %v2142_v40 = vld [vmem:[#allocation7 + $0x78] sm:$0xff] }
0x21c0   :  { %v1899_v61 = vpop.permute.xlu1 %1898 }
0x21c1   :  { %v1901_v18 = vadd.f32 %v1899_v61, %v1254_v59  ;;  %v2149_v59 = vld [vmem:[#allocation7 + $0xb0] sm:$0xff] }
0x21c2   :  { %v2141_v61 = vld [vmem:[#allocation7 + $0x70] sm:$0xff] }
0x21c3   :  { %3024 = vtanh.f32 %v1901_v18  ;;  %v2140_v18 = vld [vmem:[#allocation7 + $0x68] sm:$0xff] }
0x21d0   :  { %v3025_v41 = vpop.eup %3024 }
0x21d1   :  { %1905 = vrot.lane.b32.xlu0 %v3025_v41, %s3179_s25  ;;  %v2138_v41 = vld [vmem:[#allocation7 + $0x58] sm:$0xff] }
0x2243   :  { %v1906_v24 = vpop.permute.xlu0 %1905 }
0x2244   :  { %v1908_v43 = vmul.f32 %v1906_v24, %v1903_v16  ;;  %v2137_v16 = vld [vmem:[#allocation7 + $0x50] sm:$0xff]  ;;  %v2136_v24 = vld [vmem:[#allocation7 + $0x48] sm:$0xff] }
0x2246   :  { %v1910_v44 = vadd.f32 %v1909_v25, %v1908_v43  ;;  %v2135_v25 = vld [vmem:[#allocation7 + $0x40] sm:$0xff]  ;;  %v2133_v43 = vld [vmem:[#allocation7 + $0x30] sm:$0xff] }
0x2248   :  { %1913 = vrot.lane.b32.xlu1 %v1910_v44, %s3179_s25  ;;  %1911 = vst.msk [vmem:[#allocation3 + $0x8] sm:$0xff] %vm1489_vm4, %v1910_v44 }
0x22ba   :  { %v1914_v45 = vpop.permute.xlu1 %1913 }
0x22bb   :  { %2893 = vmatmul.mubr.msk.f32.vlgmr.msra.gmra.mxu0 %vm279_vm2, %v1914_v45  ;;  %v2131_v45 = vld [vmem:[#allocation7 + $0x20] sm:$0xff] }
0x22bc   :  { %2204 = vmatpush1.msra.mxu0 %v2157_v29  ;;  %v2161_v29 = vld [vmem:[#allocation7 + $0x110] sm:$0xff] }
0x22bd   :  { %2205 = vmatprep.subr.mxu0 %v2156_v14  ;;  %v2160_v14 = vld [vmem:[#allocation7 + $0x108] sm:$0xff] }
0x22be   :  { %2206 = vmatpush1.msra.mxu0 %v2155_v26  ;;  %v2159_v26 = vld [vmem:[#allocation7 + $0x100] sm:$0xff] }
0x22bf   :  { %2207 = vmatprep.subr.mxu0 %v2154_v30 }
0x22c0   :  { %2208 = vmatpush1.msra.mxu0 %v2153_v31 }
0x22c1   :  { %2209 = vmatprep.subr.mxu0 %v2152_v33 }
0x22c2   :  { %2210 = vmatpush1.msra.mxu0 %v2151_v34  ;;  %v2307_v34 = vld [vmem:[#allocation9 + $0xf8] sm:$0xff] }
0x22c3   :  { %2211 = vmatprep.subr.mxu0 %v2150_v35  ;;  %v2291_v35 = vld [vmem:[#allocation9 + $0x78] sm:$0xff]  ;;  %2652 = vmatprep.subr.mxu1 %v2307_v34 }
0x22c4   :  { %2212 = vmatpush1.msra.mxu0 %v2149_v59  ;;  %v2306_v59 = vld [vmem:[#allocation9 + $0xf0] sm:$0xff] }
0x22c5   :  { %2213 = vmatprep.subr.mxu0 %v2148_v36  ;;  %v2290_v36 = vld [vmem:[#allocation9 + $0x70] sm:$0xff] }
0x22c6   :  { %2214 = vmatpush1.msra.mxu0 %v2147_v37 }
0x22c7   :  { %2215 = vmatprep.subr.mxu0 %v2146_v17  ;;  %v2305_v17 = vld [vmem:[#allocation9 + $0xe8] sm:$0xff] }
0x22c8   :  { %2216 = vmatpush1.msra.mxu0 %v2145_v38 }
0x22c9   :  { %2217 = vmatprep.subr.mxu0 %v2144_v60  ;;  %v2289_v60 = vld [vmem:[#allocation9 + $0x68] sm:$0xff] }
0x22ca   :  { %2218 = vmatpush1.msra.mxu0 %v2143_v39  ;;  %v2304_v39 = vld [vmem:[#allocation9 + $0xe0] sm:$0xff] }
0x22cb   :  { %2219 = vmatprep.subr.mxu0 %v2142_v40 }
0x22cc   :  { %2220 = vmatpush1.msra.mxu0 %v2141_v61  ;;  %v2287_v61 = vld [vmem:[#allocation9 + $0x58] sm:$0xff] }
0x22cd   :  { %2221 = vmatprep.subr.mxu0 %v2140_v18  ;;  %v2302_v18 = vld [vmem:[#allocation9 + $0xd0] sm:$0xff] }
0x237b   :  { %v1983_v46 = vpop.f32.mrf.mxu0 }
0x237c   :  { %v1994_v47 = vadd.f32 %v1983_v46, %v3575_v13  ;;  %v1987_v50 = vadd.f32 %v1983_v46, %v1259_v49  ;;  %v2130_v46 = vld [vmem:[#allocation7 + $0x18] sm:$0xff] }
0x237d   :  { %v2894_v48 = vpop.f32.mrf.mxu0 }
0x237e   :  { %1996 = vrot.lane.b32.xlu0 %v1994_v47, %s3177_s3  ;;  %v2545_v51 = vmul.f32 -1.442695, %v1987_v50  ;;  %v2129_v47 = vld [vmem:[#allocation7 + $0x10] sm:$0xff]  ;;  %v2128_v48 = vld [vmem:[#allocation7 + $0x8] sm:$0xff]  ;;  %v2190_v50 = vld [vmem:[#allocation7 + $0x1f8] sm:$0xff] }
0x2380   :  { %3026 = vpow2.f32 %v2545_v51  ;;  %v2189_v51 = vld [vmem:[#allocation7 + $0x1f0] sm:$0xff] }
0x238d   :  { %v3027_v52 = vpop.eup %3026 }
0x238e   :  { %v1991_v53 = vadd.f32 1.0, %v3027_v52  ;;  %v2188_v52 = vld [vmem:[#allocation7 + $0x1e8] sm:$0xff] }
0x2390   :  { %3028 = vrcp.f32 %v1991_v53  ;;  %v2187_v53 = vld [vmem:[#allocation7 + $0x1e0] sm:$0xff] }
0x239d   :  { %v3029_v54 = vpop.eup %3028 }
0x239e   :  { %v2006_v63 = vsub.f32 1.0, %v3029_v54  ;;  %v2012_v27 = vmul.f32 %v3029_v54, %v1910_v44  ;;  %v2132_v44 = vld [vmem:[#allocation7 + $0x28] sm:$0xff] }
0x23f0   :  { %v1997_v55 = vpop.permute.xlu0 %1996 }
0x23f1   :  { %v1999_v56 = vmul.f32 %v3029_v54, %v1997_v55  ;;  %v2186_v54 = vld [vmem:[#allocation7 + $0x1d8] sm:$0xff]  ;;  %v2185_v55 = vld [vmem:[#allocation7 + $0x1d0] sm:$0xff] }
0x23f3   :  { %2001 = vrot.lane.b32.xlu1 %v1999_v56, %s3177_s3  ;;  %v2184_v56 = vld [vmem:[#allocation7 + $0x1c8] sm:$0xff] }
0x2465   :  { %v2002_v57 = vpop.permute.xlu1 %2001 }
0x2466   :  { %v2004_v58 = vadd.f32 %v2002_v57, %v1259_v49  ;;  %v2127_v49 = vld [vmem:[#allocation7] sm:$0xff] }
0x2467   :  { %v2183_v57 = vld [vmem:[#allocation7 + $0x1c0] sm:$0xff] }
0x2468   :  { %3030 = vtanh.f32 %v2004_v58  ;;  %v2182_v58 = vld [vmem:[#allocation7 + $0x1b8] sm:$0xff] }
0x2475   :  { %v3031_v62 = vpop.eup %3030 }
0x2476   :  { %2008 = vrot.lane.b32.xlu0 %v3031_v62, %s3179_s25  ;;  %v2181_v62 = vld [vmem:[#allocation7 + $0x1b0] sm:$0xff] }
0x24e8   :  { %v2009_v0 = vpop.permute.xlu0 %2008 }
0x24e9   :  { %v2011_v2 = vmul.f32 %v2009_v0, %v2006_v63  ;;  %v2180_v63 = vld [vmem:[#allocation7 + $0x1a8] sm:$0xff]  ;;  %v2179_v0 = vld [vmem:[#allocation7 + $0x1a0] sm:$0xff] }
0x24eb   :  { %v3716_v4 = vadd.f32 %v2012_v27, %v2011_v2  ;;  %v2178_v27 = vld [vmem:[#allocation7 + $0x198] sm:$0xff]  ;;  %v2177_v2 = vld [vmem:[#allocation7 + $0x190] sm:$0xff] }
0x24ed   :  { %2019 = vrot.lane.b32.xlu1 %v3716_v4, %s3179_s25 }
0x255f   :  { %v2020_v7 = vpop.permute.xlu1 %2019 }
0x2560   :  { %2904 = vmatmul.mubr.msk.f32.vlgmr.msra.gmra.mxu1 %vm279_vm2, %v2020_v7  ;;  %v2176_v7 = vld [vmem:[#allocation7 + $0x188] sm:$0xff] }
0x2561   :  { %2653 = vmatpush3.msra.mxu1 %v2291_v35 }
0x2562   :  { %2654 = vmatprep.subr.mxu1 %v2306_v59  ;;  %v2549_v59 = vld [vmem:[#allocation12] ss:$0 sm:$0xff] }
0x2563   :  { %2655 = vmatpush3.msra.mxu1 %v2290_v36 }
0x2564   :  { %2656 = vmatprep.subr.mxu1 %v2305_v17 }
0x2565   :  { %2657 = vmatpush3.msra.mxu1 %v2289_v60 }
0x2566   :  { %2658 = vmatprep.subr.mxu1 %v2304_v39 }
0x2620   :  { %v2089_v8 = vpop.f32.mrf.mxu1 }
0x2621   :  { %v2100_v15 = vadd.f32 %v2089_v8, %v3575_v13  ;;  %v2093_v19 = vadd.f32 %v2089_v8, %v1264_v12  ;;  %v2175_v8 = vld [vmem:[#allocation7 + $0x180] sm:$0xff] }
0x2622   :  { %v2905_v9 = vpop.f32.mrf.mxu1 }
0x2623   :  { %2102 = vrot.lane.b32.xlu0 %v2100_v15, %s3177_s3  ;;  %v2547_v3 = vmul.f32 -1.442695, %v2093_v19  ;;  %v2174_v15 = vld [vmem:[#allocation7 + $0x178] sm:$0xff]  ;;  %v2173_v9 = vld [vmem:[#allocation7 + $0x170] sm:$0xff]  ;;  %v2171_v19 = vld [vmem:[#allocation7 + $0x160] sm:$0xff] }
0x2625   :  { %3032 = vpow2.f32 %v2547_v3  ;;  %v2170_v3 = vld [vmem:[#allocation7 + $0x158] sm:$0xff] }
0x2632   :  { %v3033_v20 = vpop.eup %3032 }
0x2633   :  { %v2097_v21 = vadd.f32 1.0, %v3033_v20  ;;  %v2169_v20 = vld [vmem:[#allocation7 + $0x150] sm:$0xff] }
0x2635   :  { %3034 = vrcp.f32 %v2097_v21  ;;  %v2168_v21 = vld [vmem:[#allocation7 + $0x148] sm:$0xff] }
0x2642   :  { %v3725_v6 = vpop.eup %3034 }
0x2643   :  { %v2112_v30 = vsub.f32 1.0, %v3725_v6 }
0x2695   :  { %v2103_v23 = vpop.permute.xlu0 %2102 }
0x2696   :  { %v2105_v10 = vmul.f32 %v3725_v6, %v2103_v23  ;;  %v2167_v23 = vld [vmem:[#allocation7 + $0x140] sm:$0xff] }
0x2698   :  { %2107 = vrot.lane.b32.xlu1 %v2105_v10, %s3177_s3  ;;  %v2166_v10 = vld [vmem:[#allocation7 + $0x138] sm:$0xff] }
0x269c   :  { %2015 = vrot.lane.b32.xlu1 %v3716_v4, %s3178_s5 }
0x270a   :  { %v2108_v13 = vpop.permute.xlu1 %2107 }
0x270b   :  { %v2110_v28 = vadd.f32 %v2108_v13, %v1264_v12  ;;  %v2172_v12 = vld [vmem:[#allocation7 + $0x168] sm:$0xff]  ;;  %v2165_v13 = vld [vmem:[#allocation7 + $0x130] sm:$0xff] }
0x270d   :  { %3036 = vtanh.f32 %v2110_v28  ;;  %v2164_v28 = vld [vmem:[#allocation7 + $0x128] sm:$0xff] }
0x270e   :  { %v2016_v22 = vpop.permute.xlu1 %2015 }
0x270f   :  { %2018 = vst.msk [vmem:[#allocation3 + $0x8] sm:$0xff] %vm1597_vm5, %v2016_v22  ;;  %v2163_v22 = vld [vmem:[#allocation7 + $0x120] sm:$0xff] }
0x271a   :  { %v3037_v32 = vpop.eup %3036 }
0x271b   :  { %2114 = vrot.lane.b32.xlu0 %v3037_v32, %s3179_s25  ;;  %v2118_v32 = vmul.f32 %v3725_v6, %v3716_v4  ;;  %v2288_v4 = vld [vmem:[#allocation9 + $0x60] sm:$0xff]  ;;  %v2303_v6 = vld [vmem:[#allocation9 + $0xd8] sm:$0xff] }
0x271c   :  { %2659 = vmatpush3.msra.mxu1 %v2288_v4 }
0x271d   :  { %2660 = vmatprep.subr.mxu1 %v2303_v6 }
0x271e   :  { %2661 = vmatpush3.msra.mxu1 %v2287_v61 }
0x271f   :  { %1594 = vrot.lane.b32.xlu0 %v3647_v42, %s3178_s5  ;;  %v2139_v42 = vld [vmem:[#allocation7 + $0x60] sm:$0xff]  ;;  %2662 = vmatprep.subr.mxu1 %v2302_v18 }
0x2720   :  { %2222 = vmatpush1.msra.mxu0 %v2139_v42  ;;  %v2286_v42 = vld [vmem:[#allocation9 + $0x50] sm:$0xff] }
0x2721   :  { %2223 = vmatprep.subr.mxu0 %v2138_v41  ;;  %v2301_v41 = vld [vmem:[#allocation9 + $0xc8] sm:$0xff]  ;;  %2663 = vmatpush3.msra.mxu1 %v2286_v42 }
0x2722   :  { %2224 = vmatpush1.msra.mxu0 %v2137_v16  ;;  %v2285_v16 = vld [vmem:[#allocation9 + $0x48] sm:$0xff]  ;;  %2664 = vmatprep.subr.mxu1 %v2301_v41 }
0x2723   :  { %1701 = vrot.lane.b32.xlu0 %v3668_v1, %s3177_s3  ;;  %v2134_v1 = vld [vmem:[#allocation7 + $0x38] sm:$0xff]  ;;  %2225 = vmatprep.subr.mxu0 %v2136_v24  ;;  %v2300_v24 = vld [vmem:[#allocation9 + $0xc0] sm:$0xff] }
0x2724   :  { %2226 = vmatpush1.msra.mxu0 %v2135_v25  ;;  %v2284_v25 = vld [vmem:[#allocation9 + $0x40] sm:$0xff]  ;;  %2665 = vmatpush3.msra.mxu1 %v2285_v16 }
0x2725   :  { %2227 = vmatprep.subr.mxu0 %v2134_v1  ;;  %v2299_v1 = vld [vmem:[#allocation9 + $0xb8] sm:$0xff]  ;;  %2666 = vmatprep.subr.mxu1 %v2300_v24 }
0x2726   :  { %2228 = vmatpush1.msra.mxu0 %v2133_v43  ;;  %v2283_v43 = vld [vmem:[#allocation9 + $0x38] sm:$0xff]  ;;  %2667 = vmatpush3.msra.mxu1 %v2284_v25 }
0x2727   :  { %2229 = vmatprep.subr.mxu0 %v2132_v44  ;;  %v2298_v44 = vld [vmem:[#allocation9 + $0xb0] sm:$0xff]  ;;  %2668 = vmatprep.subr.mxu1 %v2299_v1 }
0x2728   :  { %2230 = vmatpush1.msra.mxu0 %v2131_v45  ;;  %v2282_v45 = vld [vmem:[#allocation9 + $0x30] sm:$0xff]  ;;  %2669 = vmatpush3.msra.mxu1 %v2283_v43 }
0x2729   :  { %2231 = vmatprep.subr.mxu0 %v2130_v46  ;;  %v2297_v46 = vld [vmem:[#allocation9 + $0xa8] sm:$0xff]  ;;  %2670 = vmatprep.subr.mxu1 %v2298_v44 }
0x272a   :  { %2232 = vmatpush1.msra.mxu0 %v2129_v47  ;;  %v2281_v47 = vld [vmem:[#allocation9 + $0x28] sm:$0xff]  ;;  %2671 = vmatpush3.msra.mxu1 %v2282_v45 }
0x272b   :  { %2233 = vmatprep.subr.mxu0 %v2128_v48  ;;  %v2296_v48 = vld [vmem:[#allocation9 + $0xa0] sm:$0xff]  ;;  %2672 = vmatprep.subr.mxu1 %v2297_v46 }
0x272c   :  { %2234 = vmatpush1.msra.mxu0 %v2127_v49  ;;  %v2280_v49 = vld [vmem:[#allocation9 + $0x20] sm:$0xff]  ;;  %2673 = vmatpush3.msra.mxu1 %v2281_v47 }
0x272d   :  { %2235 = vmatprep.subr.mxu0 %v2190_v50  ;;  %2674 = vmatprep.subr.mxu1 %v2296_v48 }
0x272e   :  { %2236 = vmatpush2.msra.mxu0 %v2189_v51  ;;  %2675 = vmatpush3.msra.mxu1 %v2280_v49 }
0x272f   :  { %2237 = vmatprep.subr.mxu0 %v2188_v52 }
0x2730   :  { %2238 = vmatpush2.msra.mxu0 %v2187_v53  ;;  %v2295_v53 = vld [vmem:[#allocation9 + $0x98] sm:$0xff] }
0x2731   :  { %2239 = vmatprep.subr.mxu0 %v2186_v54  ;;  %2676 = vmatprep.subr.mxu1 %v2295_v53  ;;  %v2279_v54 = vld [vmem:[#allocation9 + $0x18] sm:$0xff] }
0x2732   :  { %2240 = vmatpush2.msra.mxu0 %v2185_v55  ;;  %2677 = vmatpush3.msra.mxu1 %v2279_v54  ;;  %v2294_v55 = vld [vmem:[#allocation9 + $0x90] sm:$0xff] }
0x2733   :  { %2241 = vmatprep.subr.mxu0 %v2184_v56  ;;  %2678 = vmatprep.subr.mxu1 %v2294_v55  ;;  %v2278_v56 = vld [vmem:[#allocation9 + $0x10] sm:$0xff] }
0x2734   :  { %2242 = vmatpush2.msra.mxu0 %v2183_v57  ;;  %2679 = vmatpush3.msra.mxu1 %v2278_v56  ;;  %v2293_v57 = vld [vmem:[#allocation9 + $0x88] sm:$0xff] }
0x2735   :  { %2243 = vmatprep.subr.mxu0 %v2182_v58  ;;  %2680 = vmatprep.subr.mxu1 %v2293_v57  ;;  %v2277_v58 = vld [vmem:[#allocation9 + $0x8] sm:$0xff] }
0x2736   :  { %2244 = vmatpush2.msra.mxu0 %v2181_v62  ;;  %2681 = vmatpush3.msra.mxu1 %v2277_v58  ;;  %v2292_v62 = vld [vmem:[#allocation9 + $0x80] sm:$0xff] }
0x2737   :  { %2245 = vmatprep.subr.mxu0 %v2180_v63  ;;  %v2276_v63 = vld [vmem:[#allocation9] sm:$0xff]  ;;  %2682 = vmatprep.subr.mxu1 %v2292_v62 }
0x2738   :  { %2246 = vmatpush2.msra.mxu0 %v2179_v0  ;;  %2683 = vmatpush3.msra.mxu1 %v2276_v63  ;;  %v2193_v0 = vlaneseq }
0x2739   :  { %2247 = vmatprep.subr.mxu0 %v2178_v27  ;;  %2906 = vmatprep.subr.mxu1 %v3175_v5 }
0x273a   :  { %2248 = vmatpush2.msra.mxu0 %v2177_v2  ;;  %v2194_v27 = vshrl.u32 %v2193_v0, 7 }
0x273b   :  { %2249 = vmatprep.subr.mxu0 %v2176_v7  ;;  %v2191_v7 = vld [vmem:[%s3795_s11] sm:$0x3] }
0x273c   :  { %2250 = vmatpush2.msra.mxu0 %v2175_v8  ;;  %v2195_v2 = vsub.s32 0, %v2194_v27  ;;  %v2199_v8 = vsub.s32 1, %v2194_v27 }
0x273d   :  { %2251 = vmatprep.subr.mxu0 %v2174_v15 }
0x273e   :  { %2252 = vmatpush2.msra.mxu0 %v2173_v9  ;;  %v2196_v15 = vrot.slane %v2191_v7, %v2195_v2  ;;  %v2200_v9 = vrot.slane %v2191_v7, %v2199_v8 }
0x273f   :  { %2253 = vmatprep.subr.mxu0 %v2172_v12 }
0x2740   :  { %2254 = vmatpush2.msra.mxu0 %v2171_v19 }
0x2741   :  { %2255 = vmatprep.subr.mxu0 %v2170_v3 }
0x2742   :  { %2256 = vmatpush2.msra.mxu0 %v2169_v20 }
0x2743   :  { %2257 = vmatprep.subr.mxu0 %v2168_v21 }
0x2744   :  { %2258 = vmatpush2.msra.mxu0 %v2167_v23 }
0x2745   :  { %2259 = vmatprep.subr.mxu0 %v2166_v10  ;;  %v2393_v10 = vld [vmem:[%s3798_s14 + $0x38] sm:$0xff] }
0x2746   :  { %2260 = vmatpush2.msra.mxu0 %v2165_v13  ;;  %v2392_v13 = vld [vmem:[%s3798_s14 + $0x30] sm:$0xff] }
0x2747   :  { %2261 = vmatprep.subr.mxu0 %v2164_v28  ;;  %v2391_v28 = vld [vmem:[%s3798_s14 + $0x28] sm:$0xff] }
0x2748   :  { %2262 = vmatpush2.msra.mxu0 %v2163_v22  ;;  %v2390_v22 = vld [vmem:[%s3798_s14 + $0x20] sm:$0xff] }
0x2749   :  { %2263 = vmatprep.subr.mxu0 %v2162_v11  ;;  %v2389_v11 = vld [vmem:[%s3798_s14 + $0x18] sm:$0xff] }
0x274a   :  { %2264 = vmatpush2.msra.mxu0 %v2161_v29  ;;  %v2388_v29 = vld [vmem:[%s3798_s14 + $0x10] sm:$0xff] }
0x274b   :  { %2265 = vmatprep.subr.mxu0 %v2160_v14  ;;  %v2387_v14 = vld [vmem:[%s3798_s14 + $0x8] sm:$0xff] }
0x274c   :  { %2266 = vmatpush2.msra.mxu0 %v2159_v26  ;;  %v2386_v26 = vld [vmem:[%s3798_s14] sm:$0xff] }
0x278d   :  { %v2115_v31 = vpop.permute.xlu0 %2114 }
0x278e   :  { %v2117_v33 = vmul.f32 %v2115_v31, %v2112_v30  ;;  %v2548_v31 = vld [vmem:[#allocation10] ss:$0 sm:$0xff] }
0x2790   :  { %v2119_v37 = vadd.f32 %v2118_v32, %v2117_v33 }
0x2791   :  { %v1595_v38 = vpop.permute.xlu0 %1594 }
0x2792   :  { %1598 = vst.msk [vmem:[#allocation3] sm:$0xff] %vm1597_vm5, %v1595_v38  ;;  %2121 = vrot.lane.b32.xlu1 %v2119_v37, %s3177_s3 }
0x2795   :  { %v1702_v40 = vpop.permute.xlu0 %1701 }
0x2796   :  { %1705 = vst.msk [vmem:[#allocation3] sm:$0xff] %vm1704_vm6, %v1702_v40 }
0x279d   :  { %v2125_v52 = vld [vmem:[#allocation3] sm:$0xff] }
0x2804   :  { %v2122_v50 = vpop.permute.xlu1 %2121 }
0x2805   :  { %2124 = vst.msk [vmem:[#allocation3 + $0x8] sm:$0xff] %vm1704_vm6, %v2122_v50 }
0x280c   :  { %v2126_v51 = vld [vmem:[#allocation3 + $0x8] sm:$0xff] }
0x280d   :  { %2267 = vmatprep.mubr.f32.mxu0 %v2126_v51 }
0x280e   :  { %2268 = vmatmul.mubr.f32.vlgmr.msra.gmra.mxu0 %v2125_v52 }
0x28ce   :  { %v2269_v12 = vpop.f32.mrf.mxu0 }
0x28cf   :  { %v2270_v19 = vadd.f32 %v2269_v12, %v2196_v15 }
0x28d0   :  { %v2271_v3 = vpop.f32.mrf.mxu0 }
0x28d1   :  { %v2272_v20 = vadd.f32 %v2271_v3, %v2200_v9  ;;  %v2274_v23 = vmax.f32 %v2270_v19, 0.0 }
0x28d3   :  { %v2275_v21 = vmax.f32 %v2272_v20, 0.0 }
0x28d5   :  { %2379 = vmatprep.mubr.f32.mxu1 %v2275_v21 }
0x28d6   :  { %2380 = vmatmul.mubr.f32.vlgmr.msra.gmra.mxu1 %v2274_v23 }
0x28d7   :  { %2907 = vmatpush3.msra.mxu1 %v2393_v10  ;;  %2922 = vmatprep.mubr.msk.f32.mxu1 %vm3176_vm3, %v3175_v5 }
0x28d8   :  { %2908 = vmatprep.subr.mxu1 %v3175_v5 }
0x28d9   :  { %2909 = vmatpush3.msra.mxu1 %v2392_v13 }
0x28da   :  { %2910 = vmatprep.subr.mxu1 %v3175_v5 }
0x28db   :  { %2911 = vmatpush3.msra.mxu1 %v2391_v28 }
0x28dc   :  { %2912 = vmatprep.subr.mxu1 %v3175_v5 }
0x28dd   :  { %2913 = vmatpush3.msra.mxu1 %v2390_v22 }
0x28de   :  { %2914 = vmatprep.subr.mxu1 %v3175_v5 }
0x28df   :  { %2915 = vmatpush3.msra.mxu1 %v2389_v11 }
0x28e0   :  { %2916 = vmatprep.subr.mxu1 %v3175_v5 }
0x28e1   :  { %2917 = vmatpush3.msra.mxu1 %v2388_v29 }
0x28e2   :  { %2918 = vmatprep.subr.mxu1 %v3175_v5 }
0x28e3   :  { %2919 = vmatpush3.msra.mxu1 %v2387_v14 }
0x28e4   :  { %2920 = vmatprep.subr.mxu1 %v3175_v5 }
0x28e5   :  { %2921 = vmatpush3.msra.mxu1 %v2386_v26 }
0x2996   :  { %v2684_v30 = vpop.f32.mrf.mxu1 }
0x2998   :  { %v2685_v32 = vpop.f32.mrf.mxu1 }
0x2999   :  { %v2686_v33 = vadd.f32 %v2685_v32, %v2684_v30 }
0x299b   :  { %v2382_v34 = vadd.f32 %v2686_v33, %v2548_v31 }
0x299d   :  { %v2385_v35 = vmax.f32 %v2382_v34, 0.0 }
0x299f   :  { %2923 = vmatmul.mubr.msk.f32.vlgmr.msra.gmra.mxu1 %vm2401_vm7, %v2385_v35 }
0x2a5f   :  { %v2471_v36 = vpop.f32.mrf.mxu1 }
0x2a60   :  { %v2472_v37 = vadd.f32 %v2549_v59, %v2471_v36 }
0x2a61   :  { %v2924_v5 = vpop.f32.mrf.mxu1 }
0x2a62   :  { %2476 = vst.msk [vmem:[#allocation13] sm:$0x3] %vm2475_vm8, %v2472_v37 }
0x2a63   :  { %3149 = shalt.err (!%p3146_p1)
}
0x2a64   :  { %2486 = dma.vmem_to_hbm [thread:$0]  %s2484_s30, 32, %s3800_s16, [#allocation6]  }
0x2a65   :  { %3164 = dma.done.wait [#allocation6], 32  }
0x2a66   :  { %3165 = vsyncadd [#allocation6], 4294967264 }
0x2a67   :  { %2490 = vsyncpa [#allocation5], 1 }
0x2a68   :  { %2491 = vsyncpa [#allocation8], 1 }
0x2a69   :  { %2492 = vsyncpa [#allocation11], 1 }
0x2a6a   :  { %2493 = vsyncpa [#allocation6], 1 }

</bundles_post_ra>
